<compile_context>
chip_gen: v6e
topology: v6e:2x2x1
jax: 0.10.0
libtpu: 0.0.40
codegen_flags: <defaults>
</compile_context>

<pallas_src>
import jax
import jax.numpy as jnp
from jax import lax
from jax.experimental import pallas as pl
from jax.experimental.pallas import tpu as pltpu

_NEG_BIG = -1e30  # bias for padded (fake) label lanes


def _round_up(x, m):
    return ((x + m - 1) // m) * m


def _buf_bytes(shape, itemsize):
    """VMEM bytes of a buffer after (sublane=8, lane=128) padding."""
    s = [int(d) for d in shape]
    s[-1] = _round_up(s[-1], 128)
    if len(s) >= 2:
        s[-2] = _round_up(s[-2], 8)
    n = 1
    for d in s:
        n *= d
    return n * itemsize


def _make_tagger_kernel(H, fold_pred, ep_chunk, unroll):
    def kernel(emb_ref, lm_ref, wih_ref, whh_ref, brnn_ref, wout_ref, bout_ref,
               *refs):
        if fold_pred:
            out_ref, nll_ref, den_ref, cor_ref, h_scr = refs
            preds_ref = None
        else:
            out_ref, preds_ref, nll_ref, den_ref, cor_ref, h_scr = refs

        t_idx = pl.program_id(1)
        TB, BB, E = emb_ref.shape
        Hp = whh_ref.shape[1]
        Lp = wout_ref.shape[1]

        # ---- init carried hidden state + per-sequence accumulators at t=0 ----
        @pl.when(t_idx == 0)
        def _():
            h_scr[...] = jnp.zeros_like(h_scr)
            nll_ref[...] = jnp.zeros_like(nll_ref)
            den_ref[...] = jnp.zeros_like(den_ref)
            cor_ref[...] = jnp.zeros_like(cor_ref)

        wih = wih_ref[...]
        whh = whh_ref[...]
        brnn = brnn_ref[...]          # (1, Hp) f32
        wout = wout_ref[...]
        bout = bout_ref[...]          # (1, Lp) f32, padded lanes = -1e30

        # ---- hoisted input projection: ONE lane-dense MXU matmul per tile ----
        pre = (jnp.dot(emb_ref[...].reshape(TB * BB, E), wih,
                       preferred_element_type=jnp.float32)
               + brnn).reshape(TB, BB, Hp)
        out_ref[...] = pre            # reuse the output tile as pre/state buffer

        # ---- serial recurrence: only h @ W_hh + tanh stays on the crit path ----
        # TODO(synk): keep W_hh stationary in the MXU across steps with
        # pltpu.matmul_push_rhs / matmul_acc_lhs / matmul_pop so the (Hp,Hp)
        # weight is not re-pushed every timestep.
        def step(t, h):
            h_new = jnp.tanh(
                out_ref[t]
                + jnp.dot(h.astype(whh.dtype), whh,
                          preferred_element_type=jnp.float32))
            out_ref[t] = h_new
            return h_new

        h_last = lax.fori_loop(0, TB, step, h_scr[...], unroll=unroll)
        h_scr[...] = h_last

        # ---- chunked epilogue: output proj + log-softmax + argmax + masking ----
        n_chunks = TB // ep_chunk

        def ep_body(c, carry):
            t0 = pl.multiple_of(c * ep_chunk, ep_chunk)
            st = out_ref[pl.ds(t0, ep_chunk)]                       # (C,BB,Hp) f32
            logits = (jnp.dot(st.reshape(ep_chunk * BB, Hp).astype(wout.dtype),
                              wout, preferred_element_type=jnp.float32)
                      + bout).reshape(ep_chunk, BB, Lp)

            lm = lm_ref[pl.ds(t0, ep_chunk)]                        # (C,BB,1) i32
            mask3 = (lm > 0).astype(jnp.float32)                    # binary mask
            labels3 = lm - 1                                        # -1 if masked

            # argmax (first max index, torch tie-breaking) & log-softmax sharing
            # one max reduction.
            max_val = jnp.max(logits, axis=-1, keepdims=True)
            class_ids = lax.broadcasted_iota(jnp.int32, logits.shape, 2)
            pred3 = jnp.min(jnp.where(logits == max_val, class_ids, Lp),
                            axis=-1, keepdims=True)
            lse = jnp.log(jnp.sum(jnp.exp(logits - max_val),
                                  axis=-1, keepdims=True))
            true_logit = jnp.sum(jnp.where(class_ids == labels3, logits, 0.0),
                                 axis=-1, keepdims=True)
            nll3 = (max_val + lse - true_logit) * mask3             # (C,BB,1)

            # per-sequence partial sums (finalized in the wrapper)
            nll_ref[...] += jnp.sum(nll3, axis=0)                   # (BB,1)
            den_ref[...] += jnp.sum(mask3, axis=0)
            cor_ref[...] += jnp.sum((pred3 == labels3).astype(jnp.float32) * mask3,
                                    axis=0)

            if fold_pred:
                # stash pred (as f32, exact small int) into spare lane H of the
                # lane-dense combined states output -> dense HBM stores only.
                lane_ids = lax.broadcasted_iota(jnp.int32, st.shape, 2)
                out_ref[pl.ds(t0, ep_chunk)] = jnp.where(
                    lane_ids == H, pred3.astype(jnp.float32), st)
            else:
                preds_ref[pl.ds(t0, ep_chunk)] = pred3.astype(jnp.int32)
            return carry

        lax.fori_loop(0, n_chunks, ep_body, 0)

    return kernel


def tagger_forward(params, token_ids, labels, mask, *,
                   t_block=None, b_block=None,
                   compute_dtype=jnp.bfloat16):
    """Forward pass matching the PyTorch `Tagger` module (batch-first I/O).

    `mask` is treated as a binary {0,1} padding mask (standard usage).
    """
    B, T = token_ids.shape
    E = params['embed'].shape[1]
    H = params['w_hh'].shape[0]
    L = params['w_out'].shape[0]

    Lp = _round_up(L, 128)            # lane-dense logits
    Hp = _round_up(H, 128)            # lane-dense states / recurrence
    Bp = _round_up(B, 8)              # sublane-dense batch
    fold_pred = (H % 128) != 0        # spare lane at index H for the prediction
    cd = jnp.dtype(compute_dtype).itemsize

    # ---- hardware-aware defaults (VMEM capacity, #TensorCores) ----
    try:
        vmem_cap = int(pltpu.get_tpu_info().vmem_capacity_bytes)
    except Exception:
        vmem_cap = 128 << 20
    try:
        n_tc = 2 if "v7" in jax.devices()[0].device_kind.lower() else 1
    except Exception:
        n_tc = 1

    if b_block is None:
        # split the batch over v7x's two TensorCores only when each shard keeps
        # the per-step matmul throughput-bound
        b_block = Bp // 2 if (n_tc >= 2 and Bp >= 256 and Bp % 16 == 0) else Bp
    assert b_block % 8 == 0 and Bp % b_block == 0

    def _est(tb):
        ep = min(16 if tb % 16 == 0 else 8, tb)
        return (2 * _buf_bytes((tb, b_block, E), cd)              # emb tiles
                + 2 * _buf_bytes((tb, b_block, 1), 4)             # packed labels+mask
                + 2 * _buf_bytes((tb, b_block, Hp), 4)            # states(+pred) tiles
                + (0 if fold_pred else 2 * _buf_bytes((tb, b_block, 1), 4))
                + 2 * (_buf_bytes((E, Hp), cd) + _buf_bytes((Hp, Hp), cd)
                       + _buf_bytes((Hp, Lp), cd) + _buf_bytes((1, Hp), 4)
                       + _buf_bytes((1, Lp), 4))                  # weights (dbl-buffered)
                + 6 * _buf_bytes((b_block, 1), 4)                 # per-seq accumulators
                + _buf_bytes((b_block, Hp), 4)                    # h carry scratch
                + _buf_bytes((tb * b_block, Hp), 4)               # input-proj temporary
                + 6 * _buf_bytes((ep * b_block, Lp), 4))          # epilogue temporaries

    if t_block is None:
        base = 64 if vmem_cap <= (64 << 20) else (256 if vmem_cap >= (96 << 20) else 128)
        t_block = min(base, _round_up(max(T, 1), 8))
        while t_block > 8 and _est(t_block) > vmem_cap // 2:
            t_block = max(8, _round_up(t_block // 2, 8))
    assert t_block % 8 == 0
    Tp = _round_up(max(T, 1), t_block)
    ep_chunk = min(16 if t_block % 16 == 0 else 8, t_block)

    # derate the recurrence unroll when the (b_block, Hp) carry gets large
    carry_bytes = b_block * Hp * 4
    unroll = 8 if carry_bytes <= (128 << 10) else (4 if carry_bytes <= (512 << 10) else 2)
    unroll = max(1, min(unroll, t_block))

    est = _est(t_block)
    head = (48 << 20) if vmem_cap <= (64 << 20) else (100 << 20)
    vmem_limit = int(min(max(int(1.5 * est), 16 << 20), head))

    # ---- padded, time-major operands ----
    # TODO(synk): the embedding lookup stays as XLA glue (jnp.take); doing it
    # in-kernel needs scalar-prefetched token ids + a manual DMA row gather.
    ids_t = jnp.zeros((Tp, Bp), jnp.int32).at[:T, :B].set(token_ids.T)
    emb_t = jnp.take(params['embed'], ids_t, axis=0).astype(compute_dtype)

    # labels & (binary) mask packed into one int32 stream: 0 = masked-out,
    # k > 0 = label (k-1) with mask 1 -> single narrow input instead of two.
    lm = (labels.astype(jnp.int32) + 1) * (mask > 0).astype(jnp.int32)
    lm_t = jnp.zeros((Tp, Bp), jnp.int32).at[:T, :B].set(lm.T)[..., None]

    wih_t = jnp.zeros((E, Hp), jnp.float32).at[:, :H].set(
        params['w_ih'].T).astype(compute_dtype)
    whh_t = jnp.zeros((Hp, Hp), jnp.float32).at[:H, :H].set(
        params['w_hh'].T).astype(compute_dtype)
    b_rnn = jnp.zeros((1, Hp), jnp.float32).at[0, :H].set(
        (params['b_ih'] + params['b_hh']).astype(jnp.float32))
    wout_t = jnp.zeros((Hp, Lp), jnp.float32).at[:H, :L].set(
        params['w_out'].T).astype(compute_dtype)
    b_out = jnp.full((1, Lp), _NEG_BIG, jnp.float32).at[0, :L].set(
        params['b_out'].astype(jnp.float32))

    grid = (Bp // b_block, Tp // t_block)

    # NOTE: weight specs are constant across the grid; pipeline_mode=pl.Buffered(1)
    # would single-buffer them and save a little VMEM.
    in_specs = [
        pl.BlockSpec((t_block, b_block, E), lambda b, t: (t, b, 0)),
        pl.BlockSpec((t_block, b_block, 1), lambda b, t: (t, b, 0)),
        pl.BlockSpec((E, Hp), lambda b, t: (0, 0)),
        pl.BlockSpec((Hp, Hp), lambda b, t: (0, 0)),
        pl.BlockSpec((1, Hp), lambda b, t: (0, 0)),
        pl.BlockSpec((Hp, Lp), lambda b, t: (0, 0)),
        pl.BlockSpec((1, Lp), lambda b, t: (0, 0)),
    ]
    out_shapes = [jax.ShapeDtypeStruct((Tp, Bp, Hp), jnp.float32)]  # states(+pred)
    out_specs = [pl.BlockSpec((t_block, b_block, Hp), lambda b, t: (t, b, 0))]
    if not fold_pred:
        # TODO(synk): when H is already a multiple of 128 there is no spare lane;
        # predictions fall back to a narrow (Tp, Bp, 1) output (masked stores).
        out_shapes.append(jax.ShapeDtypeStruct((Tp, Bp, 1), jnp.int32))
        out_specs.append(pl.BlockSpec((t_block, b_block, 1), lambda b, t: (t, b, 0)))
    out_shapes += [jax.ShapeDtypeStruct((Bp, 1), jnp.float32) for _ in range(3)]
    out_specs += [pl.BlockSpec((b_block, 1), lambda b, t: (b, 0)) for _ in range(3)]

    outs = pl.pallas_call(
        _make_tagger_kernel(H, fold_pred, ep_chunk, unroll),
        out_shape=tuple(out_shapes),
        grid=grid,
        in_specs=in_specs,
        out_specs=tuple(out_specs),
        scratch_shapes=[pltpu.VMEM((b_block, Hp), jnp.float32)],
        compiler_params=pltpu.CompilerParams(
            dimension_semantics=("parallel", "arbitrary"),
            vmem_limit_bytes=vmem_limit),
    )(emb_t, lm_t, wih_t, whh_t, b_rnn, wout_t, b_out)

    if fold_pred:
        comb, nll_b, den_b, cor_b = outs
        preds = jnp.round(comb[:T, :B, H]).astype(jnp.int32).T      # (B, T)
    else:
        comb, preds_t, nll_b, den_b, cor_b = outs
        preds = preds_t[:T, :B, 0].T
    # TODO(synk): optional bf16 states output would halve the largest HBM write
    # (most valuable on v5e); kept f32 to match the module's dtype.
    states = jnp.transpose(comb[:T, :B, :H], (1, 0, 2))             # (B, T, H)

    # ---- finalize scalars (tiny) ----
    den = den_b[:, 0]                               # padded rows contribute 0
    per_seq = nll_b[:, 0] / (den + 1e-13)
    non_empty = jnp.sum((den > 0.0).astype(jnp.float32))
    loss = jnp.sum(per_seq) / (non_empty + 1e-13)
    acc = jnp.sum(cor_b) / jnp.sum(den)             # matches torch: no eps

    return {'states': states, 'predictions': preds, 'accuracy': acc, 'loss': loss}


def init_params(key, n_tokens, embed_dim, rnn_dim, n_labels):
    ks = jax.random.split(key, 7)
    s = 1.0 / float(jnp.sqrt(rnn_dim))
    return {
        'embed': jax.random.normal(ks[0], (n_tokens, embed_dim), jnp.float32),
        'w_ih': jax.random.uniform(ks[1], (rnn_dim, embed_dim), jnp.float32, -s, s),
        'w_hh': jax.random.uniform(ks[2], (rnn_dim, rnn_dim), jnp.float32, -s, s),
        'b_ih': jax.random.uniform(ks[3], (rnn_dim,), jnp.float32, -s, s),
        'b_hh': jax.random.uniform(ks[4], (rnn_dim,), jnp.float32, -s, s),
        'w_out': jax.random.uniform(ks[5], (n_labels, rnn_dim), jnp.float32, -s, s),
        'b_out': jax.random.uniform(ks[6], (n_labels,), jnp.float32, -s, s),
    }


def tagger_ref(params, token_ids, labels, mask):
    """Pure-JAX reference (same semantics, batch-first)."""
    emb = jnp.take(params['embed'], token_ids, axis=0)               # (B, T, E)
    B = emb.shape[0]
    H = params['w_hh'].shape[0]

    def step(h, x):
        h = jnp.tanh(x @ params['w_ih'].T + h @ params['w_hh'].T
                     + params['b_ih'] + params['b_hh'])
        return h, h

    _, states = lax.scan(step, jnp.zeros((B, H), jnp.float32),
                         jnp.transpose(emb, (1, 0, 2)))
    states = jnp.transpose(states, (1, 0, 2))                        # (B, T, H)
    logits = states @ params['w_out'].T + params['b_out']
    logp = jax.nn.log_softmax(logits, axis=-1)
    nll = -jnp.take_along_axis(logp, labels[..., None], axis=-1)[..., 0]
    maskf = mask.astype(jnp.float32)
    nll = nll * maskf
    per_seq = nll.sum(axis=1) / (maskf.sum(axis=1) + 1e-13)
    non_empty = (maskf.sum(axis=1) > 0).astype(jnp.float32).sum()
    loss = per_seq.sum() / (non_empty + 1e-13)
    pred = jnp.argmax(logits, axis=-1)
    acc = ((pred == labels).astype(jnp.float32) * maskf).sum() / maskf.sum()
    return states, pred, acc, loss, logits


if __name__ == "__main__":
    n_tokens, embed_dim, rnn_dim, n_labels = 50, 32, 32, 2
    B, T = 2, 8

    key = jax.random.PRNGKey(0)
    kp, kt, kl, km = jax.random.split(key, 4)
    params = init_params(kp, n_tokens, embed_dim, rnn_dim, n_labels)
    token_ids = jax.random.randint(kt, (B, T), 0, n_tokens, jnp.int32)
    labels = jax.random.randint(kl, (B, T), 0, n_labels, jnp.int32)
    mask = (jax.random.uniform(km, (B, T)) > 0.2).astype(jnp.float32)
    mask = mask.at[:, 0].set(1.0)   # ensure no fully-empty sequence

    ref_states, ref_pred, ref_acc, ref_loss, ref_logits = tagger_ref(
        params, token_ids, labels, mask)

    # ---- f32 MXU-input path: tight checks ----
    out32 = tagger_forward(params, token_ids, labels, mask,
                           compute_dtype=jnp.float32)
    jax.block_until_ready(out32)
    assert jnp.allclose(out32['states'], ref_states, atol=2e-2, rtol=2e-2)
    # predictions must match except at numerically razor-thin argmax ties
    srt = jnp.sort(ref_logits, axis=-1)
    margin = srt[..., -1] - srt[..., -2]
    pred_ok = (out32['predictions'] == ref_pred.astype(jnp.int32)) | (margin < 1e-3)
    assert bool(jnp.all(pred_ok))
    near_tie = jnp.sum((margin < 1e-3) & (mask > 0))
    acc_tol = float(near_tie) / float(jnp.sum(mask)) + 1e-5
    assert jnp.allclose(out32['accuracy'], ref_acc, atol=acc_tol)
    assert jnp.allclose(out32['loss'], ref_loss, atol=2e-2, rtol=2e-2)

    # ---- default path: bf16 MXU inputs, f32 accumulate / EUP math ----
    out = tagger_forward(params, token_ids, labels, mask)
    jax.block_until_ready(out)
    assert out['predictions'].shape == (B, T)
    assert jnp.allclose(out['states'], ref_states, atol=1.5e-1)
    assert jnp.allclose(out['loss'], ref_loss, atol=1.5e-1)

    print("KERNEL_OK")
</pallas_src>

<mosaic_0001>
module attributes {stable_mosaic.version = 11 : i64} {
  func.func @kernel(%arg0: i32, %arg1: i32, %arg2: memref<8x8x32xf32, #tpu.memory_space<vmem>>, %arg3: memref<8x8x1xi32, #tpu.memory_space<vmem>>, %arg4: memref<32x128xf32, #tpu.memory_space<vmem>>, %arg5: memref<128x128xf32, #tpu.memory_space<vmem>>, %arg6: memref<1x128xf32, #tpu.memory_space<vmem>>, %arg7: memref<128x128xf32, #tpu.memory_space<vmem>>, %arg8: memref<1x128xf32, #tpu.memory_space<vmem>>, %arg9: memref<8x8x128xf32, #tpu.memory_space<vmem>>, %arg10: memref<8x1xf32, #tpu.memory_space<vmem>>, %arg11: memref<8x1xf32, #tpu.memory_space<vmem>>, %arg12: memref<8x1xf32, #tpu.memory_space<vmem>>, %arg13: memref<8x128xf32, #tpu.memory_space<vmem>>) attributes {dimension_semantics = [#tpu.dimension_semantics<parallel>, #tpu.dimension_semantics<arbitrary>], iteration_bounds = array<i64: 1, 1>, scalar_prefetch = 0 : i64, scratch_operands = 1 : i64, tpu.core_type = #tpu.core_type<tc>, window_params = [{transform_indices = @transform_0, window_bounds = array<i64: 8, 8, 32>}, {transform_indices = @transform_1, window_bounds = array<i64: 8, 8, 1>}, {pipeline_mode = #tpu.pipeline_mode<synchronous>, transform_indices = @transform_2, window_bounds = array<i64: 32, 128>}, {pipeline_mode = #tpu.pipeline_mode<synchronous>, transform_indices = @transform_3, window_bounds = array<i64: 128, 128>}, {pipeline_mode = #tpu.pipeline_mode<synchronous>, transform_indices = @transform_4, window_bounds = array<i64: 1, 128>}, {pipeline_mode = #tpu.pipeline_mode<synchronous>, transform_indices = @transform_5, window_bounds = array<i64: 128, 128>}, {pipeline_mode = #tpu.pipeline_mode<synchronous>, transform_indices = @transform_6, window_bounds = array<i64: 1, 128>}, {transform_indices = @transform_7, window_bounds = array<i64: 8, 8, 128>}, {transform_indices = @transform_8, window_bounds = array<i64: 8, 1>}, {transform_indices = @transform_9, window_bounds = array<i64: 8, 1>}, {transform_indices = @transform_10, window_bounds = array<i64: 8, 1>}]} {
    %c0_i32 = arith.constant 0 : i32
    %0 = arith.cmpi eq, %arg1, %c0_i32 : i32
    %1 = arith.extui %0 : i1 to i32
    %c0_i32_0 = arith.constant 0 : i32
    %2 = arith.cmpi ne, %1, %c0_i32_0 : i32
    scf.if %2 {
      %cst_93 = arith.constant 0.000000e+00 : f32
      %163 = vector.broadcast %cst_93 : f32 to vector<8x128xf32>
      %c0_94 = arith.constant 0 : index
      %c0_95 = arith.constant 0 : index
      %164 = vector.load %arg13[%c0_94, %c0_95] : memref<8x128xf32, #tpu.memory_space<vmem>>, vector<8x128xf32>
      tpu.vector_store %arg13[%c0_94, %c0_95], %163 {strides = array<i32>} : memref<8x128xf32, #tpu.memory_space<vmem>>, vector<8x128xf32>,
      %cst_96 = arith.constant 0.000000e+00 : f32
      %165 = vector.broadcast %cst_96 : f32 to vector<8x1xf32>
      %c0_97 = arith.constant 0 : index
      %c0_98 = arith.constant 0 : index
      %166 = vector.load %arg10[%c0_97, %c0_98] : memref<8x1xf32, #tpu.memory_space<vmem>>, vector<8x1xf32>
      tpu.vector_store %arg10[%c0_97, %c0_98], %165 {strides = array<i32>} : memref<8x1xf32, #tpu.memory_space<vmem>>, vector<8x1xf32>,
      %cst_99 = arith.constant 0.000000e+00 : f32
      %167 = vector.broadcast %cst_99 : f32 to vector<8x1xf32>
      %c0_100 = arith.constant 0 : index
      %c0_101 = arith.constant 0 : index
      %168 = vector.load %arg11[%c0_100, %c0_101] : memref<8x1xf32, #tpu.memory_space<vmem>>, vector<8x1xf32>
      tpu.vector_store %arg11[%c0_100, %c0_101], %167 {strides = array<i32>} : memref<8x1xf32, #tpu.memory_space<vmem>>, vector<8x1xf32>,
      %cst_102 = arith.constant 0.000000e+00 : f32
      %169 = vector.broadcast %cst_102 : f32 to vector<8x1xf32>
      %c0_103 = arith.constant 0 : index
      %c0_104 = arith.constant 0 : index
      %170 = vector.load %arg12[%c0_103, %c0_104] : memref<8x1xf32, #tpu.memory_space<vmem>>, vector<8x1xf32>
      tpu.vector_store %arg12[%c0_103, %c0_104], %169 {strides = array<i32>} : memref<8x1xf32, #tpu.memory_space<vmem>>, vector<8x1xf32>,
    } else {
    }
    %c0 = arith.constant 0 : index
    %c0_1 = arith.constant 0 : index
    %3 = vector.load %arg4[%c0, %c0_1] : memref<32x128xf32, #tpu.memory_space<vmem>>, vector<32x128xf32>
    %c0_2 = arith.constant 0 : index
    %c0_3 = arith.constant 0 : index
    %4 = vector.load %arg5[%c0_2, %c0_3] : memref<128x128xf32, #tpu.memory_space<vmem>>, vector<128x128xf32>
    %c0_4 = arith.constant 0 : index
    %c0_5 = arith.constant 0 : index
    %5 = vector.load %arg6[%c0_4, %c0_5] : memref<1x128xf32, #tpu.memory_space<vmem>>, vector<1x128xf32>
    %c0_6 = arith.constant 0 : index
    %c0_7 = arith.constant 0 : index
    %6 = vector.load %arg7[%c0_6, %c0_7] : memref<128x128xf32, #tpu.memory_space<vmem>>, vector<128x128xf32>
    %c0_8 = arith.constant 0 : index
    %c0_9 = arith.constant 0 : index
    %7 = vector.load %arg8[%c0_8, %c0_9] : memref<1x128xf32, #tpu.memory_space<vmem>>, vector<1x128xf32>
    %c0_10 = arith.constant 0 : index
    %c0_11 = arith.constant 0 : index
    %c0_12 = arith.constant 0 : index
    %8 = vector.load %arg2[%c0_10, %c0_11, %c0_12] : memref<8x8x32xf32, #tpu.memory_space<vmem>>, vector<8x8x32xf32>
    %9 = vector.shape_cast %8 : vector<8x8x32xf32> to vector<64x32xf32>
    %cst = arith.constant dense<0.000000e+00> : vector<64x128xf32>
    %10 = tpu.matmul %9, %3, %cst {dimension_numbers = #tpu.dot_dimension_numbers<[1], [0], [0], [1], [0, 0, 1, 1], [], []>} : vector<64x32xf32>, vector<32x128xf32>, vector<64x128xf32> -> vector<64x128xf32>
    %11 = vector.broadcast %5 : vector<1x128xf32> to vector<64x128xf32>
    %12 = arith.addf %10, %11 : vector<64x128xf32>
    %13 = vector.shape_cast %12 : vector<64x128xf32> to vector<8x8x128xf32>
    %c0_13 = arith.constant 0 : index
    %c0_14 = arith.constant 0 : index
    %c0_15 = arith.constant 0 : index
    %14 = vector.load %arg9[%c0_13, %c0_14, %c0_15] : memref<8x8x128xf32, #tpu.memory_space<vmem>>, vector<8x8x128xf32>
    tpu.vector_store %arg9[%c0_13, %c0_14, %c0_15], %13 {strides = array<i32>} : memref<8x8x128xf32, #tpu.memory_space<vmem>>, vector<8x8x128xf32>,
    %c0_16 = arith.constant 0 : index
    %c0_17 = arith.constant 0 : index
    %15 = vector.load %arg13[%c0_16, %c0_17] : memref<8x128xf32, #tpu.memory_space<vmem>>, vector<8x128xf32>
    %c0_i32_18 = arith.constant 0 : i32
    %16 = arith.index_cast %c0_i32_18 : i32 to index
    %c0_19 = arith.constant 0 : index
    %c0_20 = arith.constant 0 : index
    %17 = vector.load %arg9[%16, %c0_19, %c0_20] : memref<8x8x128xf32, #tpu.memory_space<vmem>>, vector<1x8x128xf32>
    %18 = vector.shape_cast %17 : vector<1x8x128xf32> to vector<8x128xf32>
    %cst_21 = arith.constant dense<0.000000e+00> : vector<8x128xf32>
    %19 = tpu.matmul %15, %4, %cst_21 {dimension_numbers = #tpu.dot_dimension_numbers<[1], [0], [0], [1], [0, 0, 1, 1], [], []>} : vector<8x128xf32>, vector<128x128xf32>, vector<8x128xf32> -> vector<8x128xf32>
    %20 = arith.addf %18, %19 : vector<8x128xf32>
    %21 = math.tanh %20 : vector<8x128xf32>
    %22 = arith.index_cast %c0_i32_18 : i32 to index
    %c0_22 = arith.constant 0 : index
    %c0_23 = arith.constant 0 : index
    %23 = vector.load %arg9[%22, %c0_22, %c0_23] : memref<8x8x128xf32, #tpu.memory_space<vmem>>, vector<1x8x128xf32>
    %24 = vector.shape_cast %23 : vector<1x8x128xf32> to vector<8x128xf32>
    %25 = vector.shape_cast %21 : vector<8x128xf32> to vector<1x8x128xf32>
    tpu.vector_store %arg9[%22, %c0_22, %c0_23], %25 {strides = array<i32>} : memref<8x8x128xf32, #tpu.memory_space<vmem>>, vector<1x8x128xf32>,
    %c1_i32 = arith.constant 1 : i32
    %26 = arith.index_cast %c1_i32 : i32 to index
    %c0_24 = arith.constant 0 : index
    %c0_25 = arith.constant 0 : index
    %27 = vector.load %arg9[%26, %c0_24, %c0_25] : memref<8x8x128xf32, #tpu.memory_space<vmem>>, vector<1x8x128xf32>
    %28 = vector.shape_cast %27 : vector<1x8x128xf32> to vector<8x128xf32>
    %cst_26 = arith.constant dense<0.000000e+00> : vector<8x128xf32>
    %29 = tpu.matmul %21, %4, %cst_26 {dimension_numbers = #tpu.dot_dimension_numbers<[1], [0], [0], [1], [0, 0, 1, 1], [], []>} : vector<8x128xf32>, vector<128x128xf32>, vector<8x128xf32> -> vector<8x128xf32>
    %30 = arith.addf %28, %29 : vector<8x128xf32>
    %31 = math.tanh %30 : vector<8x128xf32>
    %32 = arith.index_cast %c1_i32 : i32 to index
    %c0_27 = arith.constant 0 : index
    %c0_28 = arith.constant 0 : index
    %33 = vector.load %arg9[%32, %c0_27, %c0_28] : memref<8x8x128xf32, #tpu.memory_space<vmem>>, vector<1x8x128xf32>
    %34 = vector.shape_cast %33 : vector<1x8x128xf32> to vector<8x128xf32>
    %35 = vector.shape_cast %31 : vector<8x128xf32> to vector<1x8x128xf32>
    tpu.vector_store %arg9[%32, %c0_27, %c0_28], %35 {strides = array<i32>} : memref<8x8x128xf32, #tpu.memory_space<vmem>>, vector<1x8x128xf32>,
    %c2_i32 = arith.constant 2 : i32
    %36 = arith.index_cast %c2_i32 : i32 to index
    %c0_29 = arith.constant 0 : index
    %c0_30 = arith.constant 0 : index
    %37 = vector.load %arg9[%36, %c0_29, %c0_30] : memref<8x8x128xf32, #tpu.memory_space<vmem>>, vector<1x8x128xf32>
    %38 = vector.shape_cast %37 : vector<1x8x128xf32> to vector<8x128xf32>
    %cst_31 = arith.constant dense<0.000000e+00> : vector<8x128xf32>
    %39 = tpu.matmul %31, %4, %cst_31 {dimension_numbers = #tpu.dot_dimension_numbers<[1], [0], [0], [1], [0, 0, 1, 1], [], []>} : vector<8x128xf32>, vector<128x128xf32>, vector<8x128xf32> -> vector<8x128xf32>
    %40 = arith.addf %38, %39 : vector<8x128xf32>
    %41 = math.tanh %40 : vector<8x128xf32>
    %42 = arith.index_cast %c2_i32 : i32 to index
    %c0_32 = arith.constant 0 : index
    %c0_33 = arith.constant 0 : index
    %43 = vector.load %arg9[%42, %c0_32, %c0_33] : memref<8x8x128xf32, #tpu.memory_space<vmem>>, vector<1x8x128xf32>
    %44 = vector.shape_cast %43 : vector<1x8x128xf32> to vector<8x128xf32>
    %45 = vector.shape_cast %41 : vector<8x128xf32> to vector<1x8x128xf32>
    tpu.vector_store %arg9[%42, %c0_32, %c0_33], %45 {strides = array<i32>} : memref<8x8x128xf32, #tpu.memory_space<vmem>>, vector<1x8x128xf32>,
    %c3_i32 = arith.constant 3 : i32
    %46 = arith.index_cast %c3_i32 : i32 to index
    %c0_34 = arith.constant 0 : index
    %c0_35 = arith.constant 0 : index
    %47 = vector.load %arg9[%46, %c0_34, %c0_35] : memref<8x8x128xf32, #tpu.memory_space<vmem>>, vector<1x8x128xf32>
    %48 = vector.shape_cast %47 : vector<1x8x128xf32> to vector<8x128xf32>
    %cst_36 = arith.constant dense<0.000000e+00> : vector<8x128xf32>
    %49 = tpu.matmul %41, %4, %cst_36 {dimension_numbers = #tpu.dot_dimension_numbers<[1], [0], [0], [1], [0, 0, 1, 1], [], []>} : vector<8x128xf32>, vector<128x128xf32>, vector<8x128xf32> -> vector<8x128xf32>
    %50 = arith.addf %48, %49 : vector<8x128xf32>
    %51 = math.tanh %50 : vector<8x128xf32>
    %52 = arith.index_cast %c3_i32 : i32 to index
    %c0_37 = arith.constant 0 : index
    %c0_38 = arith.constant 0 : index
    %53 = vector.load %arg9[%52, %c0_37, %c0_38] : memref<8x8x128xf32, #tpu.memory_space<vmem>>, vector<1x8x128xf32>
    %54 = vector.shape_cast %53 : vector<1x8x128xf32> to vector<8x128xf32>
    %55 = vector.shape_cast %51 : vector<8x128xf32> to vector<1x8x128xf32>
    tpu.vector_store %arg9[%52, %c0_37, %c0_38], %55 {strides = array<i32>} : memref<8x8x128xf32, #tpu.memory_space<vmem>>, vector<1x8x128xf32>,
    %c4_i32 = arith.constant 4 : i32
    %56 = arith.index_cast %c4_i32 : i32 to index
    %c0_39 = arith.constant 0 : index
    %c0_40 = arith.constant 0 : index
    %57 = vector.load %arg9[%56, %c0_39, %c0_40] : memref<8x8x128xf32, #tpu.memory_space<vmem>>, vector<1x8x128xf32>
    %58 = vector.shape_cast %57 : vector<1x8x128xf32> to vector<8x128xf32>
    %cst_41 = arith.constant dense<0.000000e+00> : vector<8x128xf32>
    %59 = tpu.matmul %51, %4, %cst_41 {dimension_numbers = #tpu.dot_dimension_numbers<[1], [0], [0], [1], [0, 0, 1, 1], [], []>} : vector<8x128xf32>, vector<128x128xf32>, vector<8x128xf32> -> vector<8x128xf32>
    %60 = arith.addf %58, %59 : vector<8x128xf32>
    %61 = math.tanh %60 : vector<8x128xf32>
    %62 = arith.index_cast %c4_i32 : i32 to index
    %c0_42 = arith.constant 0 : index
    %c0_43 = arith.constant 0 : index
    %63 = vector.load %arg9[%62, %c0_42, %c0_43] : memref<8x8x128xf32, #tpu.memory_space<vmem>>, vector<1x8x128xf32>
    %64 = vector.shape_cast %63 : vector<1x8x128xf32> to vector<8x128xf32>
    %65 = vector.shape_cast %61 : vector<8x128xf32> to vector<1x8x128xf32>
    tpu.vector_store %arg9[%62, %c0_42, %c0_43], %65 {strides = array<i32>} : memref<8x8x128xf32, #tpu.memory_space<vmem>>, vector<1x8x128xf32>,
    %c5_i32 = arith.constant 5 : i32
    %66 = arith.index_cast %c5_i32 : i32 to index
    %c0_44 = arith.constant 0 : index
    %c0_45 = arith.constant 0 : index
    %67 = vector.load %arg9[%66, %c0_44, %c0_45] : memref<8x8x128xf32, #tpu.memory_space<vmem>>, vector<1x8x128xf32>
    %68 = vector.shape_cast %67 : vector<1x8x128xf32> to vector<8x128xf32>
    %cst_46 = arith.constant dense<0.000000e+00> : vector<8x128xf32>
    %69 = tpu.matmul %61, %4, %cst_46 {dimension_numbers = #tpu.dot_dimension_numbers<[1], [0], [0], [1], [0, 0, 1, 1], [], []>} : vector<8x128xf32>, vector<128x128xf32>, vector<8x128xf32> -> vector<8x128xf32>
    %70 = arith.addf %68, %69 : vector<8x128xf32>
    %71 = math.tanh %70 : vector<8x128xf32>
    %72 = arith.index_cast %c5_i32 : i32 to index
    %c0_47 = arith.constant 0 : index
    %c0_48 = arith.constant 0 : index
    %73 = vector.load %arg9[%72, %c0_47, %c0_48] : memref<8x8x128xf32, #tpu.memory_space<vmem>>, vector<1x8x128xf32>
    %74 = vector.shape_cast %73 : vector<1x8x128xf32> to vector<8x128xf32>
    %75 = vector.shape_cast %71 : vector<8x128xf32> to vector<1x8x128xf32>
    tpu.vector_store %arg9[%72, %c0_47, %c0_48], %75 {strides = array<i32>} : memref<8x8x128xf32, #tpu.memory_space<vmem>>, vector<1x8x128xf32>,
    %c6_i32 = arith.constant 6 : i32
    %76 = arith.index_cast %c6_i32 : i32 to index
    %c0_49 = arith.constant 0 : index
    %c0_50 = arith.constant 0 : index
    %77 = vector.load %arg9[%76, %c0_49, %c0_50] : memref<8x8x128xf32, #tpu.memory_space<vmem>>, vector<1x8x128xf32>
    %78 = vector.shape_cast %77 : vector<1x8x128xf32> to vector<8x128xf32>
    %cst_51 = arith.constant dense<0.000000e+00> : vector<8x128xf32>
    %79 = tpu.matmul %71, %4, %cst_51 {dimension_numbers = #tpu.dot_dimension_numbers<[1], [0], [0], [1], [0, 0, 1, 1], [], []>} : vector<8x128xf32>, vector<128x128xf32>, vector<8x128xf32> -> vector<8x128xf32>
    %80 = arith.addf %78, %79 : vector<8x128xf32>
    %81 = math.tanh %80 : vector<8x128xf32>
    %82 = arith.index_cast %c6_i32 : i32 to index
    %c0_52 = arith.constant 0 : index
    %c0_53 = arith.constant 0 : index
    %83 = vector.load %arg9[%82, %c0_52, %c0_53] : memref<8x8x128xf32, #tpu.memory_space<vmem>>, vector<1x8x128xf32>
    %84 = vector.shape_cast %83 : vector<1x8x128xf32> to vector<8x128xf32>
    %85 = vector.shape_cast %81 : vector<8x128xf32> to vector<1x8x128xf32>
    tpu.vector_store %arg9[%82, %c0_52, %c0_53], %85 {strides = array<i32>} : memref<8x8x128xf32, #tpu.memory_space<vmem>>, vector<1x8x128xf32>,
    %c7_i32 = arith.constant 7 : i32
    %86 = arith.index_cast %c7_i32 : i32 to index
    %c0_54 = arith.constant 0 : index
    %c0_55 = arith.constant 0 : index
    %87 = vector.load %arg9[%86, %c0_54, %c0_55] : memref<8x8x128xf32, #tpu.memory_space<vmem>>, vector<1x8x128xf32>
    %88 = vector.shape_cast %87 : vector<1x8x128xf32> to vector<8x128xf32>
    %cst_56 = arith.constant dense<0.000000e+00> : vector<8x128xf32>
    %89 = tpu.matmul %81, %4, %cst_56 {dimension_numbers = #tpu.dot_dimension_numbers<[1], [0], [0], [1], [0, 0, 1, 1], [], []>} : vector<8x128xf32>, vector<128x128xf32>, vector<8x128xf32> -> vector<8x128xf32>
    %90 = arith.addf %88, %89 : vector<8x128xf32>
    %91 = math.tanh %90 : vector<8x128xf32>
    %92 = arith.index_cast %c7_i32 : i32 to index
    %c0_57 = arith.constant 0 : index
    %c0_58 = arith.constant 0 : index
    %93 = vector.load %arg9[%92, %c0_57, %c0_58] : memref<8x8x128xf32, #tpu.memory_space<vmem>>, vector<1x8x128xf32>
    %94 = vector.shape_cast %93 : vector<1x8x128xf32> to vector<8x128xf32>
    %95 = vector.shape_cast %91 : vector<8x128xf32> to vector<1x8x128xf32>
    tpu.vector_store %arg9[%92, %c0_57, %c0_58], %95 {strides = array<i32>} : memref<8x8x128xf32, #tpu.memory_space<vmem>>, vector<1x8x128xf32>,
    %c8_i32 = arith.constant 8 : i32
    %c0_59 = arith.constant 0 : index
    %c0_60 = arith.constant 0 : index
    %96 = vector.load %arg13[%c0_59, %c0_60] : memref<8x128xf32, #tpu.memory_space<vmem>>, vector<8x128xf32>
    tpu.vector_store %arg13[%c0_59, %c0_60], %91 {strides = array<i32>} : memref<8x128xf32, #tpu.memory_space<vmem>>, vector<8x128xf32>,
    %c0_i32_61 = arith.constant 0 : i32
    %c8_i32_62 = arith.constant 8 : i32
    %97 = arith.muli %c0_i32_61, %c8_i32_62 : i32
    %98 = tpu.assume_multiple %97, 8 : i32
    %99 = arith.index_cast %98 : i32 to index
    %c0_63 = arith.constant 0 : index
    %c0_64 = arith.constant 0 : index
    %100 = vector.load %arg9[%99, %c0_63, %c0_64] : memref<8x8x128xf32, #tpu.memory_space<vmem>>, vector<8x8x128xf32>
    %101 = vector.shape_cast %100 : vector<8x8x128xf32> to vector<64x128xf32>
    %cst_65 = arith.constant dense<0.000000e+00> : vector<64x128xf32>
    %102 = tpu.matmul %101, %6, %cst_65 {dimension_numbers = #tpu.dot_dimension_numbers<[1], [0], [0], [1], [0, 0, 1, 1], [], []>} : vector<64x128xf32>, vector<128x128xf32>, vector<64x128xf32> -> vector<64x128xf32>
    %103 = vector.broadcast %7 : vector<1x128xf32> to vector<64x128xf32>
    %104 = arith.addf %102, %103 : vector<64x128xf32>
    %105 = vector.shape_cast %104 : vector<64x128xf32> to vector<8x8x128xf32>
    %106 = arith.index_cast %98 : i32 to index
    %c0_66 = arith.constant 0 : index
    %c0_67 = arith.constant 0 : index
    %107 = vector.load %arg3[%106, %c0_66, %c0_67] : memref<8x8x1xi32, #tpu.memory_space<vmem>>, vector<8x8x1xi32>
    %c0_i32_68 = arith.constant 0 : i32
    %108 = vector.broadcast %c0_i32_68 : i32 to vector<8x8x1xi32>
    %109 = arith.cmpi sgt, %107, %108 : vector<8x8x1xi32>
    %110 = arith.extui %109 : vector<8x8x1xi1> to vector<8x8x1xi32>
    %111 = arith.sitofp %110 : vector<8x8x1xi32> to vector<8x8x1xf32>
    %c1_i32_69 = arith.constant 1 : i32
    %112 = vector.broadcast %c1_i32_69 : i32 to vector<8x8x1xi32>
    %113 = arith.subi %107, %112 : vector<8x8x1xi32>
    %cst_70 = arith.constant dense<0xFF800000> : vector<8x8xf32>
    %114 = vector.multi_reduction <maximumf>, %105, %cst_70 [2] : vector<8x8x128xf32> to vector<8x8xf32>
    %115 = vector.shape_cast %114 : vector<8x8xf32> to vector<8x8x1xf32>
    %116 = tpu.iota {dimensions = array<i32: 2>} : vector<8x8x128xi32>
    %117 = vector.broadcast %115 : vector<8x8x1xf32> to vector<8x8x128xf32>
    %118 = arith.cmpf oeq, %105, %117 : vector<8x8x128xf32>
    %c128_i32 = arith.constant 128 : i32
    %119 = vector.broadcast %c128_i32 : i32 to vector<8x8x128xi32>
    %120 = arith.select %118, %116, %119 : vector<8x8x128xi1>, vector<8x8x128xi32>
    %cst_71 = arith.constant dense<2147483647> : vector<8x8xi32>
    %121 = vector.multi_reduction <minsi>, %120, %cst_71 [2] : vector<8x8x128xi32> to vector<8x8xi32>
    %122 = vector.shape_cast %121 : vector<8x8xi32> to vector<8x8x1xi32>
    %123 = vector.broadcast %115 : vector<8x8x1xf32> to vector<8x8x128xf32>
    %124 = arith.subf %105, %123 : vector<8x8x128xf32>
    %125 = math.exp %124 : vector<8x8x128xf32>
    %cst_72 = arith.constant dense<0.000000e+00> : vector<8x8xf32>
    %126 = vector.multi_reduction <add>, %125, %cst_72 [2] : vector<8x8x128xf32> to vector<8x8xf32>
    %127 = vector.shape_cast %126 : vector<8x8xf32> to vector<8x8x1xf32>
    %128 = math.log %127 : vector<8x8x1xf32>
    %129 = vector.broadcast %113 : vector<8x8x1xi32> to vector<8x8x128xi32>
    %130 = arith.cmpi eq, %116, %129 : vector<8x8x128xi32>
    %cst_73 = arith.constant 0.000000e+00 : f32
    %131 = vector.broadcast %cst_73 : f32 to vector<8x8x128xf32>
    %132 = arith.select %130, %105, %131 : vector<8x8x128xi1>, vector<8x8x128xf32>
    %cst_74 = arith.constant dense<0.000000e+00> : vector<8x8xf32>
    %133 = vector.multi_reduction <add>, %132, %cst_74 [2] : vector<8x8x128xf32> to vector<8x8xf32>
    %134 = vector.shape_cast %133 : vector<8x8xf32> to vector<8x8x1xf32>
    %135 = arith.addf %115, %128 : vector<8x8x1xf32>
    %136 = arith.subf %135, %134 : vector<8x8x1xf32>
    %137 = arith.mulf %136, %111 : vector<8x8x1xf32>
    %c0_75 = arith.constant 0 : index
    %c0_76 = arith.constant 0 : index
    %138 = vector.load %arg10[%c0_75, %c0_76] : memref<8x1xf32, #tpu.memory_space<vmem>>, vector<8x1xf32>
    %cst_77 = arith.constant dense<0.000000e+00> : vector<8x1xf32>
    %139 = vector.multi_reduction <add>, %137, %cst_77 [0] : vector<8x8x1xf32> to vector<8x1xf32>
    %140 = arith.addf %138, %139 : vector<8x1xf32>
    %c0_78 = arith.constant 0 : index
    %c0_79 = arith.constant 0 : index
    %141 = vector.load %arg10[%c0_78, %c0_79] : memref<8x1xf32, #tpu.memory_space<vmem>>, vector<8x1xf32>
    tpu.vector_store %arg10[%c0_78, %c0_79], %140 {strides = array<i32>} : memref<8x1xf32, #tpu.memory_space<vmem>>, vector<8x1xf32>,
    %c0_80 = arith.constant 0 : index
    %c0_81 = arith.constant 0 : index
    %142 = vector.load %arg11[%c0_80, %c0_81] : memref<8x1xf32, #tpu.memory_space<vmem>>, vector<8x1xf32>
    %cst_82 = arith.constant dense<0.000000e+00> : vector<8x1xf32>
    %143 = vector.multi_reduction <add>, %111, %cst_82 [0] : vector<8x8x1xf32> to vector<8x1xf32>
    %144 = arith.addf %142, %143 : vector<8x1xf32>
    %c0_83 = arith.constant 0 : index
    %c0_84 = arith.constant 0 : index
    %145 = vector.load %arg11[%c0_83, %c0_84] : memref<8x1xf32, #tpu.memory_space<vmem>>, vector<8x1xf32>
    tpu.vector_store %arg11[%c0_83, %c0_84], %144 {strides = array<i32>} : memref<8x1xf32, #tpu.memory_space<vmem>>, vector<8x1xf32>,
    %c0_85 = arith.constant 0 : index
    %c0_86 = arith.constant 0 : index
    %146 = vector.load %arg12[%c0_85, %c0_86] : memref<8x1xf32, #tpu.memory_space<vmem>>, vector<8x1xf32>
    %147 = arith.cmpi eq, %122, %113 : vector<8x8x1xi32>
    %148 = arith.extui %147 : vector<8x8x1xi1> to vector<8x8x1xi32>
    %149 = arith.sitofp %148 : vector<8x8x1xi32> to vector<8x8x1xf32>
    %150 = arith.mulf %149, %111 : vector<8x8x1xf32>
    %cst_87 = arith.constant dense<0.000000e+00> : vector<8x1xf32>
    %151 = vector.multi_reduction <add>, %150, %cst_87 [0] : vector<8x8x1xf32> to vector<8x1xf32>
    %152 = arith.addf %146, %151 : vector<8x1xf32>
    %c0_88 = arith.constant 0 : index
    %c0_89 = arith.constant 0 : index
    %153 = vector.load %arg12[%c0_88, %c0_89] : memref<8x1xf32, #tpu.memory_space<vmem>>, vector<8x1xf32>
    tpu.vector_store %arg12[%c0_88, %c0_89], %152 {strides = array<i32>} : memref<8x1xf32, #tpu.memory_space<vmem>>, vector<8x1xf32>,
    %154 = tpu.iota {dimensions = array<i32: 2>} : vector<8x8x128xi32>
    %c32_i32 = arith.constant 32 : i32
    %155 = vector.broadcast %c32_i32 : i32 to vector<8x8x128xi32>
    %156 = arith.cmpi eq, %154, %155 : vector<8x8x128xi32>
    %157 = arith.sitofp %122 : vector<8x8x1xi32> to vector<8x8x1xf32>
    %158 = vector.shape_cast %157 : vector<8x8x1xf32> to vector<8x8x1xf32>
    %159 = vector.broadcast %158 : vector<8x8x1xf32> to vector<8x8x128xf32>
    %160 = arith.select %156, %159, %100 : vector<8x8x128xi1>, vector<8x8x128xf32>
    %161 = arith.index_cast %98 : i32 to index
    %c0_90 = arith.constant 0 : index
    %c0_91 = arith.constant 0 : index
    %162 = vector.load %arg9[%161, %c0_90, %c0_91] : memref<8x8x128xf32, #tpu.memory_space<vmem>>, vector<8x8x128xf32>
    tpu.vector_store %arg9[%161, %c0_90, %c0_91], %160 {strides = array<i32>} : memref<8x8x128xf32, #tpu.memory_space<vmem>>, vector<8x8x128xf32>,
    %c1_i32_92 = arith.constant 1 : i32
    return
  }
  func.func @transform_0(%arg0: i32, %arg1: i32) -> (i32, i32, i32) {
    %c0_i32 = arith.constant 0 : i32
    %c0_i32_0 = arith.constant 0 : i32
    return %arg1, %arg0, %c0_i32 : i32, i32, i32
  }
  func.func @transform_1(%arg0: i32, %arg1: i32) -> (i32, i32, i32) {
    %c0_i32 = arith.constant 0 : i32
    %c0_i32_0 = arith.constant 0 : i32
    return %arg1, %arg0, %c0_i32 : i32, i32, i32
  }
  func.func @transform_2(%arg0: i32, %arg1: i32) -> (i32, i32) {
    %c0_i32 = arith.constant 0 : i32
    %c0_i32_0 = arith.constant 0 : i32
    %c0_i32_1 = arith.constant 0 : i32
    return %c0_i32, %c0_i32_0 : i32, i32
  }
  func.func @transform_3(%arg0: i32, %arg1: i32) -> (i32, i32) {
    %c0_i32 = arith.constant 0 : i32
    %c0_i32_0 = arith.constant 0 : i32
    %c0_i32_1 = arith.constant 0 : i32
    return %c0_i32, %c0_i32_0 : i32, i32
  }
  func.func @transform_4(%arg0: i32, %arg1: i32) -> (i32, i32) {
    %c0_i32 = arith.constant 0 : i32
    %c0_i32_0 = arith.constant 0 : i32
    %c0_i32_1 = arith.constant 0 : i32
    return %c0_i32, %c0_i32_0 : i32, i32
  }
  func.func @transform_5(%arg0: i32, %arg1: i32) -> (i32, i32) {
    %c0_i32 = arith.constant 0 : i32
    %c0_i32_0 = arith.constant 0 : i32
    %c0_i32_1 = arith.constant 0 : i32
    return %c0_i32, %c0_i32_0 : i32, i32
  }
  func.func @transform_6(%arg0: i32, %arg1: i32) -> (i32, i32) {
    %c0_i32 = arith.constant 0 : i32
    %c0_i32_0 = arith.constant 0 : i32
    %c0_i32_1 = arith.constant 0 : i32
    return %c0_i32, %c0_i32_0 : i32, i32
  }
  func.func @transform_7(%arg0: i32, %arg1: i32) -> (i32, i32, i32) {
    %c0_i32 = arith.constant 0 : i32
    %c0_i32_0 = arith.constant 0 : i32
    return %arg1, %arg0, %c0_i32 : i32, i32, i32
  }
  func.func @transform_8(%arg0: i32, %arg1: i32) -> (i32, i32) {
    %c0_i32 = arith.constant 0 : i32
    %c0_i32_0 = arith.constant 0 : i32
    return %arg0, %c0_i32 : i32, i32
  }
  func.func @transform_9(%arg0: i32, %arg1: i32) -> (i32, i32) {
    %c0_i32 = arith.constant 0 : i32
    %c0_i32_0 = arith.constant 0 : i32
    return %arg0, %c0_i32 : i32, i32
  }
  func.func @transform_10(%arg0: i32, %arg1: i32) -> (i32, i32) {
    %c0_i32 = arith.constant 0 : i32
    %c0_i32_0 = arith.constant 0 : i32
    return %arg0, %c0_i32 : i32, i32
  }
}

</mosaic_0001>

<bundles_post_ra>
// kernel: tpu_custom_call.1
= control target key start
LH: loop header
LB: loop body
LE: loop exit
PB: predicated region body
PF: predicated region fallthrough
CT: control target
= control target key end

     0   :  { %16 = vsyncpa [#allocation4], 0  ;;  %s3077_s0 = inlined_call_operand.vmem [shape: f32[8,8,32], index: 0, kind: input, shape index: {}]   ;;  %s3078_s1 = inlined_call_operand.vmem [shape: s32[8,8,1], index: 1, kind: input, shape index: {}]   ;;  %s3079_s2 = inlined_call_operand.hbm [shape: f32[32,128], index: 2, kind: input, shape index: {}]   ;;  %s3080_s3 = inlined_call_operand.hbm [shape: f32[128,128], index: 3, kind: input, shape index: {}]   ;;  %s3081_s4 = inlined_call_operand.vmem [shape: f32[1,128], index: 4, kind: input, shape index: {}]   ;;  %s3082_s5 = inlined_call_operand.hbm [shape: f32[128,128], index: 5, kind: input, shape index: {}]   ;;  %s3083_s6 = inlined_call_operand.vmem [shape: f32[1,128], index: 6, kind: input, shape index: {}]   ;;  %s3084_s7 = inlined_call_operand.hbm [shape: f32[8,8,128], index: 7, kind: output, shape index: {0}]   ;;  %s3085_s8 = inlined_call_operand.vmem [shape: f32[8,1], index: 8, kind: output, shape index: {1}]   ;;  %s3086_s9 = inlined_call_operand.vmem [shape: f32[8,1], index: 9, kind: output, shape index: {2}]   ;;  %s3087_s10 = inlined_call_operand.vmem [shape: f32[8,1], index: 10, kind: output, shape index: {3}]  }
   0x1   :  { %17 = vsyncpa [#allocation7], 0 }
   0x2   :  { %18 = vsyncpa [#allocation5], 0  ;;  %s2153_s13 = smov [#allocation6]   ;;  %s2154_s15 = smov [#allocation3]  }
   0x3   :  { %s40_s14 = sshll.u32 %s2153_s13, 4  ;;  %s28_s16 = sshll.u32 %s2154_s15, 4  ;;  %s41_s14 = int_to_ptr.vmem [resolvable:$true] %s40_s14  ;;  %s29_s16 = int_to_ptr.vmem [resolvable:$true] %s28_s16 }
   0x4   :  { %s2075_s17 = scalar_lea.vmem %s41_s14, 2048  ;;  %p2080_p1 = scmp.lt.s32.totalorder %s41_s14, %s41_s14 }
   0x5   :  { %p2076_p0 = scmp.ne.s32.totalorder %s41_s14, %s2075_s17  ;;  %p2081_p2 = scmp.lt.s32.totalorder %s2075_s17, %s2075_s17 }
   0x7   :  { %p2082_p3 = por %p2081_p2, %p2080_p1 }
   0x9   :  { %p2083_p4 = pnand %p2082_p3, %p2076_p0 }
   0xb   :  { %2086 = shalt.err (!%p2083_p4)
}
   0xc   :  { %s2155_s18 = smov 128   ;;  %s2156_s19 = smov 8  }
   0xd   :  { %46 = dma.hbm_to_vmem [thread:$0]  %s3080_s3, 2048, %s41_s14, [#allocation7], %s2155_s18, %s2155_s18, %s2156_s19  }
   0xe   :  { %s2095_s22 = scalar_lea.vmem %s29_s16, 512  ;;  %p2100_p6 = scmp.lt.s32.totalorder %s29_s16, %s29_s16 }
   0xf   :  { %p2096_p5 = scmp.ne.s32.totalorder %s29_s16, %s2095_s22  ;;  %p2101_p7 = scmp.lt.s32.totalorder %s2095_s22, %s2095_s22 }
  0x11   :  { %p2102_p8 = por %p2101_p7, %p2100_p6 }
  0x13   :  { %p2103_p9 = pnand %p2102_p8, %p2096_p5 }
  0x15   :  { %2106 = shalt.err (!%p2103_p9)
}
  0x16   :  { %34 = dma.hbm_to_vmem [thread:$0]  %s3079_s2, 512, %s29_s16, [#allocation4], %s2155_s18, %s2155_s18, %s2156_s19  }
  0x17   :  { %s2157_s25 = smov [#allocation8]  }
  0x18   :  { %s54_s26 = sshll.u32 %s2157_s25, 4  ;;  %s55_s26 = int_to_ptr.vmem [resolvable:$true] %s54_s26 }
  0x19   :  { %s2115_s27 = scalar_lea.vmem %s55_s26, 2048  ;;  %p2120_p11 = scmp.lt.s32.totalorder %s55_s26, %s55_s26 }
  0x1a   :  { %p2116_p10 = scmp.ne.s32.totalorder %s55_s26, %s2115_s27  ;;  %p2121_p12 = scmp.lt.s32.totalorder %s2115_s27, %s2115_s27 }
  0x1c   :  { %p2122_p13 = por %p2121_p12, %p2120_p11 }
  0x1e   :  { %p2123_p0 = pnand %p2122_p13, %p2116_p10 }
  0x20   :  { %2126 = shalt.err (!%p2123_p0)
}
  0x21   :  { %60 = dma.hbm_to_vmem [thread:$0]  %s3082_s5, 2048, %s55_s26, [#allocation7], %s2155_s18, %s2155_s18, %s2156_s19  }
  0x22   :  { %2147 = dma.done.wait [#allocation4], 512  }
  0x23   :  { %2148 = vsyncadd [#allocation4], 4294966784 }
  0x24   :  { %2149 = dma.done.wait [#allocation7], 4096  }
  0x25   :  { %2150 = vsyncadd [#allocation7], 4294963200  ;;  %v3088_v0 = vmov 0.0   ;;  %vm2159_vm0 = vmmov 0   ;;  %v2238_v1 = vld [vmem:[#allocation6 + $0x78] sm:$0xff]  ;;  %v2240_v2 = vld [vmem:[#allocation6 + $0x70] sm:$0xff] }
  0x26   :  { %1684 = vmatprep.subr.mxu0 %v3088_v0  ;;  %1716 = vmatprep.mubr.msk.f32.mxu0 %vm2159_vm0, %v3088_v0  ;;  %v84_v3 = vld [vmem:[#allocation3 + $0x18] sm:$0xff]  ;;  %v2244_v4 = vld [vmem:[#allocation6 + $0x68] sm:$0xff]  ;;  %v83_v5 = vld [vmem:[#allocation3 + $0x10] sm:$0xff]  ;;  %vm133_vm1 = vcmask 261120  }
  0x27   :  { %1685 = vmatpush3.msra.mxu0 %v2238_v1  ;;  %1664 = vmatprep.subr.mxu1 %v84_v3  ;;  %v82_v6 = vld [vmem:[#allocation3 + $0x8] sm:$0xff]  ;;  %v2248_v7 = vld [vmem:[#allocation6 + $0x60] sm:$0xff]  ;;  %v2252_v9 = vld [vmem:[#allocation6 + $0x58] sm:$0xff] }
  0x28   :  { %1686 = vmatprep.subr.mxu0 %v3088_v0  ;;  %1665 = vmatpush3.msra.mxu1 %v84_v3  ;;  %v81_v8 = vld [vmem:[#allocation3] sm:$0xff]  ;;  %v2259_v11 = vld [vmem:[#allocation6 + $0x50] sm:$0xff]  ;;  %v120_v12 = vld [vmem:[%s3077_s0 + $0x8] sm:$0xff] }
  0x29   :  { %1687 = vmatpush3.msra.mxu0 %v2240_v2  ;;  %1666 = vmatprep.subr.mxu1 %v83_v5  ;;  %v119_v10 = vld [vmem:[%s3077_s0] sm:$0xff]  ;;  %v2266_v13 = vld [vmem:[#allocation6 + $0x48] sm:$0xff]  ;;  %v2278_v15 = vld [vmem:[#allocation6 + $0x38] sm:$0xff] }
  0x2a   :  { %1688 = vmatprep.subr.mxu0 %v3088_v0  ;;  %1667 = vmatpush3.msra.mxu1 %v83_v5  ;;  %v2272_v14 = vld [vmem:[#allocation6 + $0x40] sm:$0xff]  ;;  %v2284_v16 = vld [vmem:[#allocation6 + $0x30] sm:$0xff]  ;;  %v2290_v17 = vld [vmem:[#allocation6 + $0x28] sm:$0xff] }
  0x2b   :  { %1689 = vmatpush3.msra.mxu0 %v2244_v4  ;;  %1668 = vmatprep.subr.mxu1 %v82_v6  ;;  %v2296_v18 = vld [vmem:[#allocation6 + $0x20] sm:$0xff]  ;;  %v2302_v19 = vld [vmem:[#allocation6 + $0x18] sm:$0xff]  ;;  %v2308_v20 = vld [vmem:[#allocation6 + $0x10] sm:$0xff] }
  0x2c   :  { %1690 = vmatprep.subr.mxu0 %v3088_v0  ;;  %1669 = vmatpush3.msra.mxu1 %v82_v6  ;;  %v2314_v21 = vld [vmem:[#allocation6 + $0x8] sm:$0xff]  ;;  %v2320_v22 = vld [vmem:[#allocation6] sm:$0xff]  ;;  %v121_v31 = vld [vmem:[%s3077_s0 + $0x10] sm:$0xff] }
  0x2d   :  { %1691 = vmatpush3.msra.mxu0 %v2248_v7  ;;  %1670 = vmatprep.subr.mxu1 %v81_v8  ;;  %v2381_v24 = vld [vmem:[%s3081_s4] ss:$0 sm:$0xff]  ;;  %v122_v32 = vld [vmem:[%s3077_s0 + $0x18] sm:$0xff]  ;;  %v124_v34 = vld [vmem:[%s3077_s0 + $0x28] sm:$0xff] }
  0x2e   :  { %1692 = vmatprep.subr.mxu0 %v3088_v0  ;;  %1671 = vmatpush3.msra.mxu1 %v81_v8  ;;  %v123_v33 = vld [vmem:[%s3077_s0 + $0x20] sm:$0xff]  ;;  %v125_v35 = vld [vmem:[%s3077_s0 + $0x30] sm:$0xff]  ;;  %v126_v36 = vld [vmem:[%s3077_s0 + $0x38] sm:$0xff] }
  0x2f   :  { %1693 = vmatpush3.msra.mxu0 %v2252_v9  ;;  %1672 = vmatprep.mubr.msk.f32.mxu1 %vm133_vm1, %v119_v10  ;;  %v117_v63 = vld [vmem:[#allocation8 + $0x78] sm:$0xff]  ;;  %v116_v6 = vld [vmem:[#allocation8 + $0x70] sm:$0xff]  ;;  %v114_v8 = vld [vmem:[#allocation8 + $0x60] sm:$0xff] }
  0x30   :  { %1694 = vmatprep.subr.mxu0 %v3088_v0  ;;  %1673 = vmatmul.mubr.msk.f32.vlgmr.msra.gmra.mxu1 %vm133_vm1, %v120_v12  ;;  %v112_v10 = vld [vmem:[#allocation8 + $0x50] sm:$0xff]  ;;  %v110_v12 = vld [vmem:[#allocation8 + $0x40] sm:$0xff] }
  0x31   :  { %1695 = vmatpush3.msra.mxu0 %v2259_v11  ;;  %1754 = vmatprep.subr.mxu1 %v3088_v0 }
  0x32   :  { %1696 = vmatprep.subr.mxu0 %v3088_v0  ;;  %1755 = vmatpush3.msra.mxu1 %v2238_v1 }
  0x33   :  { %1697 = vmatpush3.msra.mxu0 %v2266_v13  ;;  %1756 = vmatprep.subr.mxu1 %v3088_v0 }
  0x34   :  { %1698 = vmatprep.subr.mxu0 %v3088_v0  ;;  %1757 = vmatpush3.msra.mxu1 %v2240_v2 }
  0x35   :  { %1699 = vmatpush3.msra.mxu0 %v2272_v14  ;;  %1758 = vmatprep.subr.mxu1 %v3088_v0 }
  0x36   :  { %1700 = vmatprep.subr.mxu0 %v3088_v0  ;;  %1759 = vmatpush3.msra.mxu1 %v2244_v4 }
  0x37   :  { %1701 = vmatpush3.msra.mxu0 %v2278_v15  ;;  %1760 = vmatprep.subr.mxu1 %v3088_v0 }
  0x38   :  { %1702 = vmatprep.subr.mxu0 %v3088_v0  ;;  %1761 = vmatpush3.msra.mxu1 %v2248_v7 }
  0x39   :  { %1703 = vmatpush3.msra.mxu0 %v2284_v16  ;;  %1762 = vmatprep.subr.mxu1 %v3088_v0 }
  0x3a   :  { %1704 = vmatprep.subr.mxu0 %v3088_v0  ;;  %1763 = vmatpush3.msra.mxu1 %v2252_v9 }
  0x3b   :  { %1705 = vmatpush3.msra.mxu0 %v2290_v17  ;;  %1764 = vmatprep.subr.mxu1 %v3088_v0 }
  0x3c   :  { %1706 = vmatprep.subr.mxu0 %v3088_v0  ;;  %1765 = vmatpush3.msra.mxu1 %v2259_v11 }
  0x3d   :  { %1707 = vmatpush3.msra.mxu0 %v2296_v18  ;;  %1766 = vmatprep.subr.mxu1 %v3088_v0 }
  0x3e   :  { %1708 = vmatprep.subr.mxu0 %v3088_v0  ;;  %1767 = vmatpush3.msra.mxu1 %v2266_v13 }
  0x3f   :  { %1709 = vmatpush3.msra.mxu0 %v2302_v19  ;;  %1768 = vmatprep.subr.mxu1 %v3088_v0 }
  0x40   :  { %1710 = vmatprep.subr.mxu0 %v3088_v0  ;;  %1769 = vmatpush3.msra.mxu1 %v2272_v14 }
  0x41   :  { %1711 = vmatpush3.msra.mxu0 %v2308_v20  ;;  %1770 = vmatprep.subr.mxu1 %v3088_v0 }
  0x42   :  { %1712 = vmatprep.subr.mxu0 %v3088_v0  ;;  %1771 = vmatpush3.msra.mxu1 %v2278_v15 }
  0x43   :  { %1713 = vmatpush3.msra.mxu0 %v2314_v21  ;;  %1772 = vmatprep.subr.mxu1 %v3088_v0 }
  0x44   :  { %1714 = vmatprep.subr.mxu0 %v3088_v0  ;;  %1773 = vmatpush3.msra.mxu1 %v2284_v16 }
  0x45   :  { %1715 = vmatpush3.msra.mxu0 %v2320_v22  ;;  %1774 = vmatprep.subr.mxu1 %v3088_v0 }
  0x46   :  { %1717 = vmatmul.mubr.f32.vlgmr.msra.gmra.mxu0 %v3088_v0  ;;  %1719 = vmatprep.subr.mxu0 %v3088_v0 }
  0x47   :  { %1720 = vmatpush3.msra.mxu0 %v2238_v1  ;;  %1751 = vmatprep.mubr.msk.f32.mxu0 %vm2159_vm0, %v3088_v0 }
  0x48   :  { %1721 = vmatprep.subr.mxu0 %v3088_v0  ;;  %1775 = vmatpush3.msra.mxu1 %v2290_v17 }
  0x49   :  { %1722 = vmatpush3.msra.mxu0 %v2240_v2  ;;  %1776 = vmatprep.subr.mxu1 %v3088_v0 }
  0x4a   :  { %1723 = vmatprep.subr.mxu0 %v3088_v0  ;;  %1777 = vmatpush3.msra.mxu1 %v2296_v18 }
  0x4b   :  { %1724 = vmatpush3.msra.mxu0 %v2244_v4  ;;  %1778 = vmatprep.subr.mxu1 %v3088_v0 }
  0x4c   :  { %1725 = vmatprep.subr.mxu0 %v3088_v0  ;;  %1779 = vmatpush3.msra.mxu1 %v2302_v19 }
  0x4d   :  { %1726 = vmatpush3.msra.mxu0 %v2248_v7  ;;  %1780 = vmatprep.subr.mxu1 %v3088_v0 }
  0x4e   :  { %1727 = vmatprep.subr.mxu0 %v3088_v0  ;;  %1781 = vmatpush3.msra.mxu1 %v2308_v20 }
  0x4f   :  { %1728 = vmatpush3.msra.mxu0 %v2252_v9  ;;  %1782 = vmatprep.subr.mxu1 %v3088_v0 }
  0x50   :  { %1729 = vmatprep.subr.mxu0 %v3088_v0  ;;  %1783 = vmatpush3.msra.mxu1 %v2314_v21 }
  0x51   :  { %1730 = vmatpush3.msra.mxu0 %v2259_v11  ;;  %1784 = vmatprep.subr.mxu1 %v3088_v0 }
  0x52   :  { %1731 = vmatprep.subr.mxu0 %v3088_v0  ;;  %1785 = vmatpush3.msra.mxu1 %v2320_v22 }
  0x53   :  { %1732 = vmatpush3.msra.mxu0 %v2266_v13  ;;  %1824 = vmatprep.subr.mxu1 %v3088_v0 }
  0x54   :  { %1733 = vmatprep.subr.mxu0 %v3088_v0  ;;  %1675 = vmatprep.mubr.msk.f32.mxu1 %vm133_vm1, %v121_v31 }
  0x55   :  { %1734 = vmatpush3.msra.mxu0 %v2272_v14  ;;  %1676 = vmatmul.mubr.msk.f32.gmra.mxu1 %vm133_vm1, %v122_v32 }
  0x56   :  { %1735 = vmatprep.subr.mxu0 %v3088_v0  ;;  %1678 = vmatprep.mubr.msk.f32.mxu1 %vm133_vm1, %v123_v33 }
  0x57   :  { %1736 = vmatpush3.msra.mxu0 %v2278_v15 }
  0x58   :  { %1737 = vmatprep.subr.mxu0 %v3088_v0 }
  0x59   :  { %1738 = vmatpush3.msra.mxu0 %v2284_v16  ;;  %1679 = vmatmul.mubr.msk.f32.gmra.mxu1 %vm133_vm1, %v124_v34 }
  0x5a   :  { %1739 = vmatprep.subr.mxu0 %v3088_v0  ;;  %1681 = vmatprep.mubr.msk.f32.mxu1 %vm133_vm1, %v125_v35 }
  0x5b   :  { %1740 = vmatpush3.msra.mxu0 %v2290_v17 }
  0x5c   :  { %1741 = vmatprep.subr.mxu0 %v3088_v0 }
  0x5d   :  { %1742 = vmatpush3.msra.mxu0 %v2296_v18  ;;  %1682 = vmatmul.mubr.msk.f32.gmra.mxu1 %vm133_vm1, %v126_v36 }
  0x5e   :  { %1743 = vmatprep.subr.mxu0 %v3088_v0  ;;  %1786 = vmatprep.mubr.msk.f32.mxu1 %vm2159_vm0, %v3088_v0 }
  0x5f   :  { %1744 = vmatpush3.msra.mxu0 %v2302_v19 }
  0x60   :  { %1745 = vmatprep.subr.mxu0 %v3088_v0 }
  0x61   :  { %1746 = vmatpush3.msra.mxu0 %v2308_v20 }
  0x62   :  { %1747 = vmatprep.subr.mxu0 %v3088_v0 }
  0x63   :  { %1748 = vmatpush3.msra.mxu0 %v2314_v21 }
  0x64   :  { %1749 = vmatprep.subr.mxu0 %v3088_v0 }
  0x65   :  { %1750 = vmatpush3.msra.mxu0 %v2320_v22 }
  0x66   :  { %1789 = vmatprep.subr.mxu0 %v3088_v0 }
  0xf0   :  { %v1674_v23 = vpop.f32.mrf.mxu1 }
  0xf1   :  { %v230_v37 = vadd.f32 %v1674_v23, %v2381_v24 }
  0xf2   :  { %v224_v25 = vpop.f32.mrf.mxu1 }
  0xf3   :  { %v225_v26 = vadd.f32 %v2381_v24, %v224_v25 }
 0x106   :  { %v339_v27 = vpop.f32.mrf.mxu0 }
 0x107   :  { %v343_v28 = vadd.f32 %v339_v27, %v225_v26  ;;  %v2626_v27 = vld [vmem:[%s3083_s6] ss:$0 sm:$0xff] }
 0x108   :  { %v1718_v29 = vpop.f32.mrf.mxu0 }
 0x109   :  { %2019 = vtanh.f32 %v343_v28 }
 0x115   :  { %v1677_v42 = vpop.f32.mrf.mxu1 }
 0x116   :  { %v2384_v30 = vpop.eup %2019  ;;  %v240_v53 = vadd.f32 %v1677_v42, %v2381_v24  ;;  %v2160_v42 = vmov 0  }
 0x117   :  { %1752 = vmatmul.mubr.f32.vlgmr.msra.gmra.mxu0 %v2384_v30  ;;  %v234_v43 = vpop.f32.mrf.mxu1  ;;  %2018 = vset.pattern.permute.xlu0 %v2160_v42 }
 0x118   :  { %1790 = vmatpush3.msra.mxu0 %v2238_v1  ;;  %1821 = vmatprep.mubr.msk.f32.mxu0 %vm2159_vm0, %v3088_v0  ;;  %v235_v48 = vadd.f32 %v2381_v24, %v234_v43  ;;  %v1050_v43 = vlaneseq }
 0x119   :  { %1791 = vmatprep.subr.mxu0 %v3088_v0  ;;  %v2485_v44 = vpop.f32.mrf.mxu1  ;;  %2017 = vset.pattern.permute.xlu1 %v2160_v42 }
 0x11a   :  { %1792 = vmatpush3.msra.mxu0 %v2240_v2 }
 0x11b   :  { %1793 = vmatprep.subr.mxu0 %v3088_v0  ;;  %v2487_v45 = vpop.f32.mrf.mxu1 }
 0x11c   :  { %1794 = vmatpush3.msra.mxu0 %v2244_v4  ;;  %v245_v58 = vadd.f32 %v2381_v24, %v2487_v45 }
 0x11d   :  { %1795 = vmatprep.subr.mxu0 %v3088_v0  ;;  %v2489_v46 = vpop.f32.mrf.mxu1 }
 0x11e   :  { %1796 = vmatpush3.msra.mxu0 %v2248_v7 }
 0x11f   :  { %1797 = vmatprep.subr.mxu0 %v3088_v0  ;;  %v2491_v47 = vpop.f32.mrf.mxu1 }
 0x120   :  { %1798 = vmatpush3.msra.mxu0 %v2252_v9 }
 0x121   :  { %1799 = vmatprep.subr.mxu0 %v3088_v0 }
 0x122   :  { %1800 = vmatpush3.msra.mxu0 %v2259_v11 }
 0x123   :  { %1801 = vmatprep.subr.mxu0 %v3088_v0 }
 0x124   :  { %1802 = vmatpush3.msra.mxu0 %v2266_v13 }
 0x125   :  { %1803 = vmatprep.subr.mxu0 %v3088_v0 }
 0x126   :  { %1804 = vmatpush3.msra.mxu0 %v2272_v14 }
 0x127   :  { %1805 = vmatprep.subr.mxu0 %v3088_v0 }
 0x128   :  { %1806 = vmatpush3.msra.mxu0 %v2278_v15 }
 0x129   :  { %1807 = vmatprep.subr.mxu0 %v3088_v0 }
 0x12a   :  { %1808 = vmatpush3.msra.mxu0 %v2284_v16 }
 0x12b   :  { %1809 = vmatprep.subr.mxu0 %v3088_v0 }
 0x12c   :  { %1810 = vmatpush3.msra.mxu0 %v2290_v17 }
 0x12d   :  { %1811 = vmatprep.subr.mxu0 %v3088_v0 }
 0x12e   :  { %1812 = vmatpush3.msra.mxu0 %v2296_v18 }
 0x12f   :  { %1813 = vmatprep.subr.mxu0 %v3088_v0 }
 0x130   :  { %1814 = vmatpush3.msra.mxu0 %v2302_v19 }
 0x131   :  { %1815 = vmatprep.subr.mxu0 %v3088_v0 }
 0x132   :  { %1816 = vmatpush3.msra.mxu0 %v2308_v20 }
 0x133   :  { %1817 = vmatprep.subr.mxu0 %v3088_v0 }
 0x134   :  { %1818 = vmatpush3.msra.mxu0 %v2314_v21 }
 0x135   :  { %1819 = vmatprep.subr.mxu0 %v3088_v0 }
 0x136   :  { %1820 = vmatpush3.msra.mxu0 %v2320_v22 }
 0x137   :  { %1859 = vmatprep.subr.mxu0 %v3088_v0 }
 0x1d7   :  { %v414_v38 = vpop.f32.mrf.mxu0 }
 0x1d8   :  { %v418_v39 = vadd.f32 %v414_v38, %v230_v37 }
 0x1d9   :  { %v1753_v40 = vpop.f32.mrf.mxu0 }
 0x1da   :  { %2021 = vtanh.f32 %v418_v39 }
 0x1e7   :  { %v2448_v41 = vpop.eup %2021 }
 0x1e8   :  { %1787 = vmatmul.mubr.f32.vlgmr.msra.gmra.mxu1 %v2448_v41 }
 0x1e9   :  { %1825 = vmatpush3.msra.mxu1 %v2238_v1  ;;  %1856 = vmatprep.mubr.msk.f32.mxu1 %vm2159_vm0, %v3088_v0 }
 0x1ea   :  { %1826 = vmatprep.subr.mxu1 %v3088_v0 }
 0x1eb   :  { %1827 = vmatpush3.msra.mxu1 %v2240_v2 }
 0x1ec   :  { %1828 = vmatprep.subr.mxu1 %v3088_v0 }
 0x1ed   :  { %1829 = vmatpush3.msra.mxu1 %v2244_v4 }
 0x1ee   :  { %1830 = vmatprep.subr.mxu1 %v3088_v0 }
 0x1ef   :  { %1831 = vmatpush3.msra.mxu1 %v2248_v7 }
 0x1f0   :  { %1832 = vmatprep.subr.mxu1 %v3088_v0 }
 0x1f1   :  { %1833 = vmatpush3.msra.mxu1 %v2252_v9 }
 0x1f2   :  { %1834 = vmatprep.subr.mxu1 %v3088_v0 }
 0x1f3   :  { %1835 = vmatpush3.msra.mxu1 %v2259_v11 }
 0x1f4   :  { %1836 = vmatprep.subr.mxu1 %v3088_v0 }
 0x1f5   :  { %1837 = vmatpush3.msra.mxu1 %v2266_v13 }
 0x1f6   :  { %1838 = vmatprep.subr.mxu1 %v3088_v0 }
 0x1f7   :  { %1839 = vmatpush3.msra.mxu1 %v2272_v14 }
 0x1f8   :  { %1840 = vmatprep.subr.mxu1 %v3088_v0 }
 0x1f9   :  { %1841 = vmatpush3.msra.mxu1 %v2278_v15 }
 0x1fa   :  { %1842 = vmatprep.subr.mxu1 %v3088_v0 }
 0x1fb   :  { %1843 = vmatpush3.msra.mxu1 %v2284_v16 }
 0x1fc   :  { %1844 = vmatprep.subr.mxu1 %v3088_v0 }
 0x1fd   :  { %1845 = vmatpush3.msra.mxu1 %v2290_v17 }
 0x1fe   :  { %1846 = vmatprep.subr.mxu1 %v3088_v0 }
 0x1ff   :  { %1847 = vmatpush3.msra.mxu1 %v2296_v18 }
 0x200   :  { %1848 = vmatprep.subr.mxu1 %v3088_v0 }
 0x201   :  { %1849 = vmatpush3.msra.mxu1 %v2302_v19 }
 0x202   :  { %1850 = vmatprep.subr.mxu1 %v3088_v0 }
 0x203   :  { %1851 = vmatpush3.msra.mxu1 %v2308_v20 }
 0x204   :  { %1852 = vmatprep.subr.mxu1 %v3088_v0 }
 0x205   :  { %1853 = vmatpush3.msra.mxu1 %v2314_v21 }
 0x206   :  { %1854 = vmatprep.subr.mxu1 %v3088_v0 }
 0x207   :  { %1855 = vmatpush3.msra.mxu1 %v2320_v22 }
 0x208   :  { %1894 = vmatprep.subr.mxu1 %v3088_v0 }
 0x2a8   :  { %v489_v49 = vpop.f32.mrf.mxu1 }
 0x2a9   :  { %v493_v50 = vadd.f32 %v489_v49, %v235_v48 }
 0x2aa   :  { %v1788_v51 = vpop.f32.mrf.mxu1 }
 0x2ab   :  { %2023 = vtanh.f32 %v493_v50 }
 0x2b8   :  { %v2494_v52 = vpop.eup %2023 }
 0x2b9   :  { %1822 = vmatmul.mubr.f32.vlgmr.msra.gmra.mxu0 %v2494_v52 }
 0x2ba   :  { %1860 = vmatpush3.msra.mxu0 %v2238_v1  ;;  %1891 = vmatprep.mubr.msk.f32.mxu0 %vm2159_vm0, %v3088_v0 }
 0x2bb   :  { %1861 = vmatprep.subr.mxu0 %v3088_v0 }
 0x2bc   :  { %1862 = vmatpush3.msra.mxu0 %v2240_v2 }
 0x2bd   :  { %1863 = vmatprep.subr.mxu0 %v3088_v0 }
 0x2be   :  { %1864 = vmatpush3.msra.mxu0 %v2244_v4 }
 0x2bf   :  { %1865 = vmatprep.subr.mxu0 %v3088_v0 }
 0x2c0   :  { %1866 = vmatpush3.msra.mxu0 %v2248_v7 }
 0x2c1   :  { %1867 = vmatprep.subr.mxu0 %v3088_v0 }
 0x2c2   :  { %1868 = vmatpush3.msra.mxu0 %v2252_v9 }
 0x2c3   :  { %1869 = vmatprep.subr.mxu0 %v3088_v0 }
 0x2c4   :  { %1870 = vmatpush3.msra.mxu0 %v2259_v11 }
 0x2c5   :  { %1871 = vmatprep.subr.mxu0 %v3088_v0 }
 0x2c6   :  { %1872 = vmatpush3.msra.mxu0 %v2266_v13 }
 0x2c7   :  { %1873 = vmatprep.subr.mxu0 %v3088_v0 }
 0x2c8   :  { %1874 = vmatpush3.msra.mxu0 %v2272_v14 }
 0x2c9   :  { %1875 = vmatprep.subr.mxu0 %v3088_v0 }
 0x2ca   :  { %1876 = vmatpush3.msra.mxu0 %v2278_v15 }
 0x2cb   :  { %1877 = vmatprep.subr.mxu0 %v3088_v0 }
 0x2cc   :  { %1878 = vmatpush3.msra.mxu0 %v2284_v16 }
 0x2cd   :  { %1879 = vmatprep.subr.mxu0 %v3088_v0 }
 0x2ce   :  { %1880 = vmatpush3.msra.mxu0 %v2290_v17 }
 0x2cf   :  { %1881 = vmatprep.subr.mxu0 %v3088_v0 }
 0x2d0   :  { %1882 = vmatpush3.msra.mxu0 %v2296_v18 }
 0x2d1   :  { %1883 = vmatprep.subr.mxu0 %v3088_v0 }
 0x2d2   :  { %1884 = vmatpush3.msra.mxu0 %v2302_v19 }
 0x2d3   :  { %1885 = vmatprep.subr.mxu0 %v3088_v0 }
 0x2d4   :  { %1886 = vmatpush3.msra.mxu0 %v2308_v20 }
 0x2d5   :  { %1887 = vmatprep.subr.mxu0 %v3088_v0 }
 0x2d6   :  { %1888 = vmatpush3.msra.mxu0 %v2314_v21 }
 0x2d7   :  { %1889 = vmatprep.subr.mxu0 %v3088_v0 }
 0x2d8   :  { %1890 = vmatpush3.msra.mxu0 %v2320_v22 }
 0x2d9   :  { %1929 = vmatprep.subr.mxu0 %v3088_v0 }
 0x379   :  { %v564_v54 = vpop.f32.mrf.mxu0 }
 0x37a   :  { %v568_v55 = vadd.f32 %v564_v54, %v240_v53 }
 0x37b   :  { %v1823_v56 = vpop.f32.mrf.mxu0 }
 0x37c   :  { %2025 = vtanh.f32 %v568_v55 }
 0x389   :  { %v2532_v57 = vpop.eup %2025 }
 0x38a   :  { %3100 = vst [vmem:[#allocation13_spill] sm:$0xff] %v2532_v57  ;;  %1857 = vmatmul.mubr.f32.vlgmr.msra.gmra.mxu1 %v2532_v57 }
 0x38b   :  { %1895 = vmatpush3.msra.mxu1 %v2238_v1  ;;  %1926 = vmatprep.mubr.msk.f32.mxu1 %vm2159_vm0, %v3088_v0 }
 0x38c   :  { %1896 = vmatprep.subr.mxu1 %v3088_v0 }
 0x38d   :  { %1897 = vmatpush3.msra.mxu1 %v2240_v2 }
 0x38e   :  { %1898 = vmatprep.subr.mxu1 %v3088_v0 }
 0x38f   :  { %1899 = vmatpush3.msra.mxu1 %v2244_v4 }
 0x390   :  { %1900 = vmatprep.subr.mxu1 %v3088_v0 }
 0x391   :  { %1901 = vmatpush3.msra.mxu1 %v2248_v7 }
 0x392   :  { %1902 = vmatprep.subr.mxu1 %v3088_v0 }
 0x393   :  { %1903 = vmatpush3.msra.mxu1 %v2252_v9 }
 0x394   :  { %1904 = vmatprep.subr.mxu1 %v3088_v0 }
 0x395   :  { %1905 = vmatpush3.msra.mxu1 %v2259_v11 }
 0x396   :  { %1906 = vmatprep.subr.mxu1 %v3088_v0 }
 0x397   :  { %1907 = vmatpush3.msra.mxu1 %v2266_v13 }
 0x398   :  { %1908 = vmatprep.subr.mxu1 %v3088_v0 }
 0x399   :  { %1909 = vmatpush3.msra.mxu1 %v2272_v14 }
 0x39a   :  { %1910 = vmatprep.subr.mxu1 %v3088_v0 }
 0x39b   :  { %1911 = vmatpush3.msra.mxu1 %v2278_v15 }
 0x39c   :  { %1912 = vmatprep.subr.mxu1 %v3088_v0 }
 0x39d   :  { %1913 = vmatpush3.msra.mxu1 %v2284_v16 }
 0x39e   :  { %1914 = vmatprep.subr.mxu1 %v3088_v0 }
 0x39f   :  { %1915 = vmatpush3.msra.mxu1 %v2290_v17 }
 0x3a0   :  { %1916 = vmatprep.subr.mxu1 %v3088_v0 }
 0x3a1   :  { %1917 = vmatpush3.msra.mxu1 %v2296_v18 }
 0x3a2   :  { %1918 = vmatprep.subr.mxu1 %v3088_v0 }
 0x3a3   :  { %1919 = vmatpush3.msra.mxu1 %v2302_v19 }
 0x3a4   :  { %1920 = vmatprep.subr.mxu1 %v3088_v0 }
 0x3a5   :  { %1921 = vmatpush3.msra.mxu1 %v2308_v20 }
 0x3a6   :  { %1922 = vmatprep.subr.mxu1 %v3088_v0 }
 0x3a7   :  { %1923 = vmatpush3.msra.mxu1 %v2314_v21 }
 0x3a8   :  { %1924 = vmatprep.subr.mxu1 %v3088_v0 }
 0x3a9   :  { %1925 = vmatpush3.msra.mxu1 %v2320_v22 }
 0x3aa   :  { %1964 = vmatprep.subr.mxu1 %v117_v63 }
 0x44a   :  { %v639_v59 = vpop.f32.mrf.mxu1 }
 0x44b   :  { %v643_v60 = vadd.f32 %v639_v59, %v245_v58 }
 0x44c   :  { %v1858_v61 = vpop.f32.mrf.mxu1 }
 0x44d   :  { %2027 = vtanh.f32 %v643_v60 }
 0x45a   :  { %v2570_v62 = vpop.eup %2027 }
 0x45b   :  { %3101 = vst [vmem:[#allocation14_spill] sm:$0xff] %v2570_v62  ;;  %1892 = vmatmul.mubr.f32.vlgmr.msra.gmra.mxu0 %v2570_v62 }
 0x45c   :  { %1930 = vmatpush3.msra.mxu0 %v2238_v1  ;;  %1961 = vmatprep.mubr.msk.f32.mxu0 %vm2159_vm0, %v3088_v0  ;;  %v250_v1 = vadd.f32 %v2485_v44, %v2381_v24  ;;  %v2652_v44 = vand.u32 127, %v1050_v43 }
 0x45d   :  { %1931 = vmatprep.subr.mxu0 %v3088_v0 }
 0x45e   :  { %1932 = vmatpush3.msra.mxu0 %v2240_v2 }
 0x45f   :  { %1933 = vmatprep.subr.mxu0 %v3088_v0 }
 0x460   :  { %1934 = vmatpush3.msra.mxu0 %v2244_v4 }
 0x461   :  { %1935 = vmatprep.subr.mxu0 %v3088_v0 }
 0x462   :  { %1936 = vmatpush3.msra.mxu0 %v2248_v7  ;;  %v115_v7 = vld [vmem:[#allocation8 + $0x68] sm:$0xff] }
 0x463   :  { %1937 = vmatprep.subr.mxu0 %v3088_v0 }
 0x464   :  { %1938 = vmatpush3.msra.mxu0 %v2252_v9  ;;  %v113_v9 = vld [vmem:[#allocation8 + $0x58] sm:$0xff] }
 0x465   :  { %1939 = vmatprep.subr.mxu0 %v3088_v0 }
 0x466   :  { %1940 = vmatpush3.msra.mxu0 %v2259_v11  ;;  %v111_v11 = vld [vmem:[#allocation8 + $0x48] sm:$0xff] }
 0x467   :  { %1941 = vmatprep.subr.mxu0 %v3088_v0 }
 0x468   :  { %1942 = vmatpush3.msra.mxu0 %v2266_v13  ;;  %v109_v13 = vld [vmem:[#allocation8 + $0x38] sm:$0xff] }
 0x469   :  { %1943 = vmatprep.subr.mxu0 %v3088_v0 }
 0x46a   :  { %1944 = vmatpush3.msra.mxu0 %v2272_v14  ;;  %v108_v14 = vld [vmem:[#allocation8 + $0x30] sm:$0xff] }
 0x46b   :  { %1945 = vmatprep.subr.mxu0 %v3088_v0 }
 0x46c   :  { %1946 = vmatpush3.msra.mxu0 %v2278_v15  ;;  %v107_v15 = vld [vmem:[#allocation8 + $0x28] sm:$0xff] }
 0x46d   :  { %1947 = vmatprep.subr.mxu0 %v3088_v0 }
 0x46e   :  { %1948 = vmatpush3.msra.mxu0 %v2284_v16  ;;  %v106_v16 = vld [vmem:[#allocation8 + $0x20] sm:$0xff] }
 0x46f   :  { %1949 = vmatprep.subr.mxu0 %v3088_v0 }
 0x470   :  { %1950 = vmatpush3.msra.mxu0 %v2290_v17  ;;  %v105_v17 = vld [vmem:[#allocation8 + $0x18] sm:$0xff] }
 0x471   :  { %1951 = vmatprep.subr.mxu0 %v3088_v0 }
 0x472   :  { %1952 = vmatpush3.msra.mxu0 %v2296_v18  ;;  %v104_v18 = vld [vmem:[#allocation8 + $0x10] sm:$0xff] }
 0x473   :  { %1953 = vmatprep.subr.mxu0 %v3088_v0 }
 0x474   :  { %1954 = vmatpush3.msra.mxu0 %v2302_v19  ;;  %v103_v19 = vld [vmem:[#allocation8 + $0x8] sm:$0xff] }
 0x475   :  { %1955 = vmatprep.subr.mxu0 %v3088_v0 }
 0x476   :  { %1956 = vmatpush3.msra.mxu0 %v2308_v20  ;;  %v102_v20 = vld [vmem:[#allocation8] sm:$0xff] }
 0x477   :  { %1957 = vmatprep.subr.mxu0 %v3088_v0 }
 0x478   :  { %1958 = vmatpush3.msra.mxu0 %v2314_v21  ;;  %v255_v21 = vadd.f32 %v2381_v24, %v2491_v47 }
 0x479   :  { %1959 = vmatprep.subr.mxu0 %v3088_v0 }
 0x47a   :  { %1960 = vmatpush3.msra.mxu0 %v2320_v22 }
 0x51b   :  { %v714_v2 = vpop.f32.mrf.mxu0 }
 0x51c   :  { %v718_v3 = vadd.f32 %v714_v2, %v250_v1 }
 0x51d   :  { %v1893_v4 = vpop.f32.mrf.mxu0 }
 0x51e   :  { %2029 = vtanh.f32 %v718_v3 }
 0x52b   :  { %v2608_v5 = vpop.eup %2029 }
 0x52c   :  { %3102 = vst [vmem:[#allocation15_spill] sm:$0xff] %v2608_v5  ;;  %1927 = vmatmul.mubr.f32.vlgmr.msra.gmra.mxu1 %v2608_v5 }
 0x52d   :  { %1965 = vmatpush3.msra.mxu1 %v117_v63  ;;  %1996 = vmatprep.mubr.f32.mxu1 %v2384_v30 }
 0x52e   :  { %1966 = vmatprep.subr.mxu1 %v116_v6 }
 0x52f   :  { %1967 = vmatpush3.msra.mxu1 %v116_v6 }
 0x530   :  { %1968 = vmatprep.subr.mxu1 %v115_v7 }
 0x531   :  { %1969 = vmatpush3.msra.mxu1 %v115_v7 }
 0x532   :  { %1970 = vmatprep.subr.mxu1 %v114_v8 }
 0x533   :  { %1971 = vmatpush3.msra.mxu1 %v114_v8 }
 0x534   :  { %1972 = vmatprep.subr.mxu1 %v113_v9 }
 0x535   :  { %1973 = vmatpush3.msra.mxu1 %v113_v9 }
 0x536   :  { %1974 = vmatprep.subr.mxu1 %v112_v10 }
 0x537   :  { %1975 = vmatpush3.msra.mxu1 %v112_v10 }
 0x538   :  { %1976 = vmatprep.subr.mxu1 %v111_v11 }
 0x539   :  { %1977 = vmatpush3.msra.mxu1 %v111_v11  ;;  %v2693_v11 = vld [vmem:[%s3078_s1 + $0x8] sm:$0xff] }
 0x53a   :  { %1978 = vmatprep.subr.mxu1 %v110_v12 }
 0x53b   :  { %1979 = vmatpush3.msra.mxu1 %v110_v12  ;;  %v260_v12 = vadd.f32 %v2489_v46, %v2381_v24  ;;  %v2712_v24 = vld [vmem:[%s3078_s1 + $0x18] sm:$0xff] }
 0x53c   :  { %1980 = vmatprep.subr.mxu1 %v109_v13  ;;  %v2716_v46 = vadd.s32 4294967295, %v2712_v24 }
 0x53d   :  { %1981 = vmatpush3.msra.mxu1 %v109_v13 }
 0x53e   :  { %1982 = vmatprep.subr.mxu1 %v108_v14 }
 0x53f   :  { %1983 = vmatpush3.msra.mxu1 %v108_v14 }
 0x540   :  { %1984 = vmatprep.subr.mxu1 %v107_v15 }
 0x541   :  { %1985 = vmatpush3.msra.mxu1 %v107_v15  ;;  %v2698_v15 = vadd.s32 4294967295, %v2693_v11 }
 0x542   :  { %1986 = vmatprep.subr.mxu1 %v106_v16 }
 0x543   :  { %1987 = vmatpush3.msra.mxu1 %v106_v16 }
 0x544   :  { %1988 = vmatprep.subr.mxu1 %v105_v17 }
 0x545   :  { %1989 = vmatpush3.msra.mxu1 %v105_v17  ;;  %v2703_v17 = vld [vmem:[%s3078_s1 + $0x10] sm:$0xff] }
 0x546   :  { %1990 = vmatprep.subr.mxu1 %v104_v18 }
 0x547   :  { %1991 = vmatpush3.msra.mxu1 %v104_v18  ;;  %v2707_v18 = vadd.s32 4294967295, %v2703_v17 }
 0x548   :  { %1992 = vmatprep.subr.mxu1 %v103_v19 }
 0x549   :  { %1993 = vmatpush3.msra.mxu1 %v103_v19 }
 0x54a   :  { %1994 = vmatprep.subr.mxu1 %v102_v20 }
 0x54b   :  { %1995 = vmatpush3.msra.mxu1 %v102_v20 }
 0x54c   :  { %1997 = vmatmul.mubr.f32.vlgmr.msra.gmra.mxu1 %v2448_v41 }
 0x54d   :  { %1999 = vmatprep.mubr.f32.mxu1 %v2494_v52 }
 0x550   :  { %2000 = vmatmul.mubr.f32.gmra.mxu1 %v2532_v57 }
 0x551   :  { %2002 = vmatprep.mubr.f32.mxu1 %v2570_v62 }
 0x554   :  { %2003 = vmatmul.mubr.f32.gmra.mxu1 %v2608_v5 }
 0x5ec   :  { %v789_v22 = vpop.f32.mrf.mxu1 }
 0x5ed   :  { %v793_v23 = vadd.f32 %v789_v22, %v255_v21 }
 0x5ee   :  { %v1928_v25 = vpop.f32.mrf.mxu1 }
 0x5ef   :  { %2031 = vtanh.f32 %v793_v23 }
 0x5fc   :  { %v2619_v26 = vpop.eup %2031 }
 0x5fd   :  { %3103 = vst [vmem:[#allocation16_spill] sm:$0xff] %v2619_v26  ;;  %1962 = vmatmul.mubr.f32.vlgmr.msra.gmra.mxu0 %v2619_v26  ;;  %2005 = vmatprep.mubr.f32.mxu1 %v2619_v26 }
 0x60c   :  { %v1998_v28 = vpop.f32.mrf.mxu1 }
 0x60d   :  { %v2629_v29 = vadd.f32 %v1998_v28, %v2626_v27 }
 0x60e   :  { %v954_v31 = vpop.f32.mrf.mxu1 }
 0x60f   :  { %1036 = vmax.xlane.f32.xlu0 %v2629_v29  ;;  %v2633_v33 = vadd.f32 %v2626_v27, %v954_v31 }
 0x610   :  { %v2001_v32 = vpop.f32.mrf.mxu1 }
 0x611   :  { %v2636_v34 = vadd.f32 %v2001_v32, %v2626_v27 }
 0x612   :  { %v964_v35 = vpop.f32.mrf.mxu1 }
 0x613   :  { %1040 = vmax.xlane.f32.xlu1 %v2636_v34  ;;  %1034 = vmax.xlane.f32.xlu0 %v2633_v33  ;;  %v2641_v37 = vadd.f32 %v2626_v27, %v964_v35 }
 0x614   :  { %v2004_v36 = vpop.f32.mrf.mxu1 }
 0x615   :  { %v2648_v40 = vadd.f32 %v2004_v36, %v2626_v27 }
 0x616   :  { %v974_v38 = vpop.f32.mrf.mxu1 }
 0x617   :  { %v2644_v39 = vadd.f32 %v2626_v27, %v974_v38  ;;  %1038 = vmax.xlane.f32.xlu1 %v2641_v37 }
 0x619   :  { %1042 = vmax.xlane.f32.xlu0 %v2644_v39 }
 0x61b   :  { %1044 = vmax.xlane.f32.xlu1 %v2648_v40 }
 0x698   :  { %v2654_v45 = vpop.xlane.xlu0 %1036 }
 0x699   :  { %vm1053_vm2 = vcmp.eq.f32.partialorder %v2629_v29, %v2654_v45 }
 0x69a   :  { %v1061_v47 = vsel %vm1053_vm2, %v2652_v44, 128  ;;  %vm77_vm2 = vcmask 7168  }
 0x69b   :  { %v1083_v48 = vshra.s32 %v1061_v47, 16  ;;  %v1082_v20 = vand.u32 65535, %v1061_v47 }
 0x69c   :  { %v2659_v49 = vpop.xlane.xlu1 %1040  ;;  %v2661_v50 = vpop.xlane.xlu0 %1034 }
 0x69d   :  { %vm1055_vm3 = vcmp.eq.f32.partialorder %v2636_v34, %v2659_v49  ;;  %vm1052_vm4 = vcmp.eq.f32.partialorder %v2633_v33, %v2661_v50  ;;  %v1085_v51 = vcvt.s32.f32 %v1083_v48  ;;  %v1084_v23 = vcvt.s32.f32 %v1082_v20 }
 0x69e   :  { %v1063_v53 = vsel %vm1055_vm3, %v2652_v44, 128  ;;  %v1060_v54 = vsel %vm1052_vm4, %v2652_v44, 128  ;;  %v1183_v5 = vsub.f32 %v2636_v34, %v2659_v49 }
 0x69f   :  { %v1111_v55 = vshra.s32 %v1063_v53, 16  ;;  %v1069_v56 = vshra.s32 %v1060_v54, 16  ;;  %1086 = vmin.xlane.f32.xlu1 %v1085_v51  ;;  %v1068_v22 = vand.u32 65535, %v1060_v54  ;;  %v1110_v25 = vand.u32 65535, %v1063_v53 }
 0x6a0   :  { %v2669_v58 = vpop.xlane.xlu1 %1038  ;;  %v1194_v62 = vmul.f32 1.442695, %v1183_v5 }
 0x6a1   :  { %3104 = vst [vmem:[#allocation17_spill] sm:$0xff] %v2669_v58  ;;  %vm1054_vm5 = vcmp.eq.f32.partialorder %v2641_v37, %v2669_v58  ;;  %v1113_v59 = vcvt.s32.f32 %v1111_v55  ;;  %v1071_v61 = vcvt.s32.f32 %v1069_v56  ;;  %v1070_v35 = vcvt.s32.f32 %v1068_v22 }
 0x6a2   :  { %v2673_v60 = vpop.xlane.xlu0 %1042  ;;  %v1062_v63 = vsel %vm1054_vm5, %v2652_v44, 128  ;;  %v1112_v38 = vcvt.s32.f32 %v1110_v25 }
 0x6a3   :  { %3105 = vst [vmem:[#allocation18_spill] sm:$0xff] %v2673_v60  ;;  %vm1056_vm6 = vcmp.eq.f32.partialorder %v2644_v39, %v2673_v60  ;;  %v1097_v1 = vshra.s32 %v1062_v63, 16  ;;  %1114 = vmin.xlane.f32.xlu1 %v1113_v59  ;;  %1072 = vmin.xlane.f32.xlu0 %v1071_v61  ;;  %v1096_v36 = vand.u32 65535, %v1062_v63  ;;  %v1184_v26 = vsub.f32 %v2644_v39, %v2673_v60 }
 0x6a4   :  { %v2678_v2 = vpop.xlane.xlu1 %1044  ;;  %v1064_v3 = vsel %vm1056_vm6, %v2652_v44, 128 }
 0x6a5   :  { %vm1057_vm7 = vcmp.eq.f32.partialorder %v2648_v40, %v2678_v2  ;;  %v1099_v4 = vcvt.s32.f32 %v1097_v1  ;;  %v1125_v7 = vshra.s32 %v1064_v3, 16  ;;  %v1098_v48 = vcvt.s32.f32 %v1096_v36 }
 0x6a6   :  { %v2684_v6 = vsel %vm1057_vm7, %v2652_v44, 128  ;;  %vm1003_vm7 = vcmp.gt.s32.totalorder %v2693_v11, 0 }
 0x6a7   :  { %v1139_v8 = vshra.s32 %v2684_v6, 16  ;;  %1100 = vmin.xlane.f32.xlu0 %v1099_v4  ;;  %v1127_v10 = vcvt.s32.f32 %v1125_v7  ;;  %v2767_v7 = vld [vmem:[%s3078_s1 + $0x28] sm:$0xff] }
 0x6a9   :  { %v2687_v9 = vcvt.s32.f32 %v1139_v8  ;;  %v2775_v8 = vld [vmem:[%s3078_s1 + $0x30] sm:$0xff] }
 0x6ab   :  { %1142 = vmin.xlane.f32.xlu1 %v2687_v9  ;;  %1128 = vmin.xlane.f32.xlu0 %v1127_v10 }
 0x6bd   :  { %v864_v13 = vpop.f32.mrf.mxu0 }
 0x6be   :  { %v868_v14 = vadd.f32 %v864_v13, %v260_v12 }
 0x6bf   :  { %v1963_v16 = vpop.f32.mrf.mxu0 }
 0x6c0   :  { %2033 = vtanh.f32 %v868_v14 }
 0x6c1   :  { %1240 = vperm.xlu0 %2018, %v2698_v15  }
 0x6c5   :  { %1243 = vperm.xlu0 %2018, %v2707_v18  }
 0x6c9   :  { %1246 = vperm.xlu0 %2018, %v2716_v46  }
 0x6cd   :  { %v2719_v19 = vpop.eup %2033 }
 0x6ce   :  { %3106 = vst [vmem:[#allocation19_spill] sm:$0xff] %v2719_v19  ;;  %2006 = vmatmul.mubr.f32.gmra.mxu1 %v2719_v19  ;;  %v1182_v19 = vsub.f32 %v2641_v37, %v2669_v58 }
 0x728   :  { %v2722_v21 = vpop.xlane.xlu1 %1086 }
 0x729   :  { %vm1088_vm8 = vcmp.eq.f32.partialorder %v1085_v51, %v2722_v21  ;;  %v1124_v51 = vand.u32 65535, %v1064_v3  ;;  %v2758_v3 = vld [vmem:[%s3078_s1] sm:$0xff] }
 0x72a   :  { %v2725_v28 = vsel %vm1088_vm8, %v1084_v23, inf  ;;  %vm1002_vm6 = vcmp.gt.s32.totalorder %v2758_v3, 0 }
 0x72b   :  { %v1126_v55 = vcvt.s32.f32 %v1124_v51  ;;  %v2815_v51 = vld [vmem:[%s3078_s1 + $0x20] sm:$0xff] }
 0x72c   :  { %v2727_v31 = vpop.xlane.xlu1 %1114  ;;  %v2729_v32 = vpop.xlane.xlu0 %1072 }
 0x72d   :  { %vm1074_vm9 = vcmp.eq.f32.partialorder %v1071_v61, %v2729_v32  ;;  %vm1116_vm10 = vcmp.eq.f32.partialorder %v1113_v59, %v2727_v31 }
 0x72e   :  { %v2733_v42 = vsel %vm1074_vm9, %v1070_v35, inf  ;;  %v2735_v43 = vsel %vm1116_vm10, %v1112_v38, inf  ;;  %vm1004_vm10 = vcmp.gt.s32.totalorder %v2703_v17, 0 }
 0x730   :  { %v2737_v47 = vpop.xlane.xlu0 %1100 }
 0x731   :  { %vm1102_vm11 = vcmp.eq.f32.partialorder %v1099_v4, %v2737_v47  ;;  %v2761_v4 = vadd.s32 4294967295, %v2758_v3 }
 0x732   :  { %v2740_v53 = vsel %vm1102_vm11, %v1098_v48, inf }
 0x734   :  { %v2742_v54 = vpop.xlane.xlu0 %1128  ;;  %v2786_v14 = vpop.xlane.xlu1 %1142 }
 0x735   :  { %vm1130_vm12 = vcmp.eq.f32.partialorder %v1127_v10, %v2742_v54  ;;  %v2779_v10 = vadd.s32 4294967295, %v2775_v8  ;;  %vm1144_vm1 = vcmp.eq.f32.partialorder %v2687_v9, %v2786_v14 }
 0x736   :  { %v2745_v56 = vsel %vm1130_vm12, %v1126_v55, inf  ;;  %v2818_v55 = vadd.s32 4294967295, %v2815_v51 }
 0x737   :  { %3108 = vst [vmem:[#allocation21_spill] sm:$0xff] %v2779_v10 }
 0x73c   :  { %v2782_v12 = vpop.permute.xlu0 %1240 }
 0x73d   :  { %vm1261_vm0 = vcmp.eq.s32.totalorder %v2652_v44, %v2782_v12 }
 0x740   :  { %v2784_v13 = vpop.permute.xlu0 %1243 }
 0x741   :  { %vm1262_vm3 = vcmp.eq.s32.totalorder %v2652_v44, %v2784_v13 }
 0x744   :  { %v2788_v16 = vpop.permute.xlu0 %1246 }
 0x745   :  { %vm1263_vm4 = vcmp.eq.s32.totalorder %v2652_v44, %v2788_v16 }
 0x78e   :  { %v2007_v59 = vpop.f32.mrf.mxu1 }
 0x78f   :  { %v2748_v61 = vadd.f32 %v2007_v59, %v2626_v27  ;;  %v2824_v59 = vld [vmem:[%s3078_s1 + $0x38] sm:$0xff] }
 0x790   :  { %v984_v63 = vpop.f32.mrf.mxu1 }
 0x791   :  { %v2751_v1 = vadd.f32 %v2626_v27, %v984_v63  ;;  %1048 = vmax.xlane.f32.xlu1 %v2748_v61  ;;  %v2770_v27 = vadd.s32 4294967295, %v2767_v7  ;;  %v2827_v63 = vadd.s32 4294967295, %v2824_v59 }
 0x793   :  { %1046 = vmax.xlane.f32.xlu0 %v2751_v1  ;;  %3107 = vst [vmem:[#allocation20_spill] sm:$0xff] %v2770_v27  ;;  %3109 = vst [vmem:[#allocation22_spill] sm:$0xff] %v2827_v63 }
 0x7a2   :  { %1237 = vperm.xlu1 %2017, %v2761_v4  }
 0x7a9   :  { %1252 = vperm.xlu0 %2018, %v2770_v27   ;;  %v1196_v27 = vmul.f32 1.442695, %v1184_v26 }
 0x7ad   :  { %1255 = vperm.xlu0 %2018, %v2779_v10  }
 0x81a   :  { %v2790_v20 = vpop.xlane.xlu1 %1048 }
 0x81b   :  { %vm1059_vm13 = vcmp.eq.f32.partialorder %v2748_v61, %v2790_v20 }
 0x81c   :  { %v2794_v22 = vpop.xlane.xlu0 %1046  ;;  %v2797_v23 = vsel %vm1059_vm13, %v2652_v44, 128  ;;  %vm1005_vm13 = vcmp.gt.s32.totalorder %v2712_v24, 0 }
 0x81d   :  { %vm1058_vm14 = vcmp.eq.f32.partialorder %v2751_v1, %v2794_v22  ;;  %v1167_v25 = vshra.s32 %v2797_v23, 16 }
 0x81e   :  { %v2803_v35 = vsel %vm1058_vm14, %v2652_v44, 128  ;;  %v1238_v5 = vpop.permute.xlu1 %1237 }
 0x81f   :  { %v2805_v36 = vcvt.s32.f32 %v1167_v25  ;;  %v1153_v38 = vshra.s32 %v2803_v35, 16  ;;  %v1181_v25 = vsub.f32 %v2629_v29, %v2654_v45  ;;  %vm1260_vm15 = vcmp.eq.s32.totalorder %v2652_v44, %v1238_v5 }
 0x821   :  { %1170 = vmin.xlane.f32.xlu1 %v2805_v36  ;;  %v2809_v48 = vcvt.s32.f32 %v1153_v38  ;;  %v1180_v38 = vsub.f32 %v2633_v33, %v2661_v50  ;;  %v1190_v0 = vmul.f32 1.442695, %v1181_v25  ;;  %v1185_v25 = vsub.f32 %v2648_v40, %v2678_v2 }
 0x823   :  { %1156 = vmin.xlane.f32.xlu0 %v2809_v48  ;;  %v1188_v10 = vmul.f32 1.442695, %v1180_v38  ;;  %2035 = vpow2.f32 %v1190_v0  ;;  %v1198_v57 = vmul.f32 1.442695, %v1185_v25  ;;  %v1186_v38 = vsub.f32 %v2751_v1, %v2794_v22 }
 0x824   :  { %v3110_v25 = vmov 0.0   ;;  %v1253_v9 = vpop.permute.xlu0 %1252 }
 0x825   :  { %2037 = vpow2.f32 %v1188_v10  ;;  %v1200_v26 = vmul.f32 1.442695, %v1186_v38  ;;  %78 = vst.msk [vmem:[%s3085_s8] sm:$0xff] %vm77_vm2, %v3110_v25  ;;  %79 = vst.msk [vmem:[%s3086_s9] sm:$0xff] %vm77_vm2, %v3110_v25  ;;  %vm1265_vm11 = vcmp.eq.s32.totalorder %v2652_v44, %v1253_v9 }
 0x826   :  { %2039 = vpow2.f32 %v1196_v27  ;;  %80 = vst.msk [vmem:[%s3087_s10] sm:$0xff] %vm77_vm2, %v3110_v25  ;;  %v1273_v17 = vsel %vm1265_vm11, %v2648_v40, 0.0 }
 0x830   :  { %v2036_v60 = vpop.eup %2035 }
 0x832   :  { %1249 = vperm.xlu1 %2017, %v2818_v55   ;;  %v2038_v0 = vpop.eup %2037 }
 0x833   :  { %v2040_v58 = vpop.eup %2039 }
 0x839   :  { %1258 = vperm.xlu0 %2018, %v2827_v63   ;;  %v1192_v63 = vmul.f32 1.442695, %v1182_v19 }
 0x83b   :  { %2041 = vpow2.f32 %v1192_v63 }
 0x83c   :  { %2043 = vpow2.f32 %v1194_v62  ;;  %v1187_v62 = vsub.f32 %v2748_v61, %v2790_v20 }
 0x83d   :  { %2045 = vpow2.f32 %v1198_v57 }
 0x83e   :  { %2047 = vpow2.f32 %v1200_v26  ;;  %v1202_v57 = vmul.f32 1.442695, %v1187_v62 }
 0x840   :  { %2049 = vpow2.f32 %v1202_v57  ;;  %v2917_v57 = vsel %vm1005_vm13, 1.0, %v3110_v25 }
 0x841   :  { %v1341_v40 = vsel %vm77_vm2, %v2917_v57, 0.0 }
 0x848   :  { %v2042_v19 = vpop.eup %2041 }
 0x849   :  { %v2044_v27 = vpop.eup %2043 }
 0x856   :  { %1206 = vadd.xlane.f32.xlu1 %v2036_v60  ;;  %v2046_v60 = vpop.eup %2045 }
 0x857   :  { %v2048_v10 = vpop.eup %2047 }
 0x858   :  { %1204 = vadd.xlane.f32.xlu0 %v2038_v0  ;;  %v1152_v0 = vand.u32 65535, %v2803_v35  ;;  %v2897_v35 = vsel %vm1003_vm7, 1.0, %v3110_v25 }
 0x859   :  { %v1337_v26 = vsel %vm77_vm2, %v2897_v35, 0.0 }
 0x85a   :  { %1212 = vadd.xlane.f32.xlu1 %v2040_v58  ;;  %v1268_v58 = vsel %vm1260_vm15, %v2633_v33, 0.0  ;;  %v1269_v33 = vsel %vm1261_vm0, %v2629_v29, 0.0  ;;  %v1270_v29 = vsel %vm1262_vm3, %v2641_v37, 0.0  ;;  %v1154_v16 = vcvt.s32.f32 %v1152_v0 }
 0x85b   :  { %vm1006_vm15 = vcmp.gt.s32.totalorder %v2815_v51, 0  ;;  %vm1007_vm0 = vcmp.gt.s32.totalorder %v2767_v7, 0  ;;  %vm1008_vm3 = vcmp.gt.s32.totalorder %v2775_v8, 0 }
 0x85c   :  { %1208 = vadd.xlane.f32.xlu0 %v2042_v19  ;;  %v2908_v19 = vsel %vm1004_vm10, 1.0, %v3110_v25  ;;  %v2924_v24 = vsel %vm1006_vm15, 1.0, %v3110_v25  ;;  %v2937_v51 = vsel %vm1008_vm3, 1.0, %v3110_v25 }
 0x85d   :  { %v1339_v62 = vsel %vm77_vm2, %v2908_v19, 0.0 }
 0x85e   :  { %1076 = vmin.xlane.f32.xlu1 %v2733_v42  ;;  %v1138_v42 = vand.u32 65535, %v2684_v6  ;;  %v1271_v6 = vsel %vm1263_vm4, %v2636_v34, 0.0  ;;  %vm1403_vm4 = vcmp.eq.s32.totalorder %v2652_v44, 32 }
 0x860   :  { %1210 = vadd.xlane.f32.xlu0 %v2044_v27 }
 0x862   :  { %1104 = vmin.xlane.f32.xlu1 %v2740_v53  ;;  %v1140_v53 = vcvt.s32.f32 %v1138_v42  ;;  %v2930_v42 = vsel %vm1007_vm0, 1.0, %v3110_v25 }
 0x864   :  { %1214 = vadd.xlane.f32.xlu0 %v2046_v60  ;;  %v1145_v63 = vsel %vm1144_vm1, %v1140_v53, inf  ;;  %vm1009_vm1 = vcmp.gt.s32.totalorder %v2824_v59, 0  ;;  %v1335_v59 = vld [vmem:[%s3086_s9] sm:$0xff] }
 0x865   :  { %v2942_v7 = vsel %vm1009_vm1, 1.0, %v3110_v25 }
 0x866   :  { %1276 = vadd.xlane.f32.xlu1 %v1268_v58  ;;  %v1343_v58 = vsel %vm77_vm2, %v2924_v24, 0.0 }
 0x868   :  { %1090 = vmin.xlane.f32.xlu0 %v2725_v28  ;;  %v2050_v28 = vpop.eup %2049 }
 0x86a   :  { %1216 = vadd.xlane.f32.xlu1 %v2048_v10 }
 0x86c   :  { %1118 = vmin.xlane.f32.xlu0 %v2735_v43  ;;  %v1166_v43 = vand.u32 65535, %v2797_v23  ;;  %v2894_v23 = vsel %vm1002_vm6, 1.0, %v3110_v25 }
 0x86e   :  { %1132 = vmin.xlane.f32.xlu1 %v2745_v56  ;;  %v1256_v56 = vpop.permute.xlu0 %1255  ;;  %v1168_v38 = vcvt.s32.f32 %v1166_v43 }
 0x86f   :  { %vm1266_vm12 = vcmp.eq.s32.totalorder %v2652_v44, %v1256_v56  ;;  %v1079_v56 = vcvt.f32.s32 %v2729_v32 }
 0x870   :  { %1278 = vadd.xlane.f32.xlu0 %v1269_v33  ;;  %v1347_v33 = vsel %vm77_vm2, %v2937_v51, 0.0 }
 0x872   :  { %1146 = vmin.xlane.f32.xlu1 %v1145_v63 }
 0x874   :  { %1218 = vadd.xlane.f32.xlu0 %v2050_v28  ;;  %v1349_v28 = vsel %vm77_vm2, %v2942_v7, 0.0 }
 0x878   :  { %1280 = vadd.xlane.f32.xlu0 %v1270_v29 }
 0x87c   :  { %1282 = vadd.xlane.f32.xlu0 %v1271_v6 }
 0x8aa   :  { %v2881_v12 = vpop.xlane.xlu1 %1170 }
 0x8ab   :  { %vm1172_vm5 = vcmp.eq.f32.partialorder %v2805_v36, %v2881_v12  ;;  %v1336_v36 = vsel %vm77_vm2, %v2894_v23, 0.0 }
 0x8ac   :  { %v1173_v37 = vsel %vm1172_vm5, %v1168_v38, inf  ;;  %v2888_v13 = vpop.xlane.xlu0 %1156 }
 0x8ad   :  { %1174 = vmin.xlane.f32.xlu1 %v1173_v37  ;;  %vm1158_vm8 = vcmp.eq.f32.partialorder %v2809_v48, %v2888_v13  ;;  %v1338_v48 = vadd.f32 %v1337_v26, %v1336_v36  ;;  %v1080_v37 = vshll.u32 %v1079_v56, 16 }
 0x8ae   :  { %v1250_v34 = vpop.permute.xlu1 %1249  ;;  %v1159_v3 = vsel %vm1158_vm8, %v1154_v16, inf }
 0x8af   :  { %vm1264_vm9 = vcmp.eq.s32.totalorder %v2652_v44, %v1250_v34  ;;  %v1340_v27 = vadd.f32 %v1339_v62, %v1338_v48  ;;  %v1107_v34 = vcvt.f32.s32 %v2737_v47 }
 0x8b0   :  { %v1272_v11 = vsel %vm1264_vm9, %v2644_v39, 0.0  ;;  %v1274_v39 = vsel %vm1266_vm12, %v2751_v1, 0.0 }
 0x8b1   :  { %1284 = vadd.xlane.f32.xlu0 %v1272_v11  ;;  %1160 = vmin.xlane.f32.xlu1 %v1159_v3  ;;  %v1342_v1 = vadd.f32 %v1341_v40, %v1340_v27  ;;  %v1108_v26 = vshll.u32 %v1107_v34, 16 }
 0x8b3   :  { %v1344_v10 = vadd.f32 %v1343_v58, %v1342_v1 }
 0x8b4   :  { %v1259_v5 = vpop.permute.xlu0 %1258 }
 0x8b5   :  { %1286 = vadd.xlane.f32.xlu0 %v1273_v17  ;;  %1288 = vadd.xlane.f32.xlu1 %v1274_v39  ;;  %vm1267_vm14 = vcmp.eq.s32.totalorder %v2652_v44, %v1259_v5  ;;  %v1093_v39 = vcvt.f32.s32 %v2722_v21  ;;  %v1121_v21 = vcvt.f32.s32 %v2727_v31 }
 0x8b6   :  { %v1275_v60 = vsel %vm1267_vm14, %v2748_v61, 0.0  ;;  %v1345_v61 = vsel %vm77_vm2, %v2930_v42, 0.0 }
 0x8b7   :  { %v1346_v53 = vadd.f32 %v1345_v61, %v1344_v10  ;;  %v1094_v58 = vshll.u32 %v1093_v39, 16 }
 0x8b9   :  { %1290 = vadd.xlane.f32.xlu0 %v1275_v60  ;;  %v1348_v63 = vadd.f32 %v1347_v33, %v1346_v53 }
 0x8bb   :  { %v1350_v29 = vadd.f32 %v1349_v28, %v1348_v63  ;;  %v1135_v63 = vcvt.f32.s32 %v2742_v54  ;;  %v1149_v28 = vcvt.f32.s32 %v2786_v14 }
 0x8bd   :  { %v1351_v6 = vadd.f32 %v1350_v29, %v1335_v59  ;;  %v1150_v34 = vshll.u32 %v1149_v28, 16 }
 0x8bf   :  { %1352 = vst.msk [vmem:[%s3086_s9] sm:$0xff] %vm77_vm2, %v1351_v6  ;;  %s2161_s9 = smov [#allocation9]  }
 0x8c0   :  { %s1433_s27 = sshll.u32 %s2161_s9, 4  ;;  %s1434_s27 = int_to_ptr.vmem [resolvable:$true] %s1433_s27 }
 0x8c1   :  { %s2127_s3 = scalar_lea.vmem %s1434_s27, 1024  ;;  %p2132_p2 = scmp.lt.s32.totalorder %s1434_s27, %s1434_s27 }
 0x8c2   :  { %p2128_p1 = scmp.ne.s32.totalorder %s1434_s27, %s2127_s3  ;;  %p2133_p3 = scmp.lt.s32.totalorder %s2127_s3, %s2127_s3 }
 0x8c4   :  { %p2134_p4 = por %p2133_p3, %p2132_p2 }
 0x8c6   :  { %p2135_p5 = pnand %p2134_p4, %p2128_p1 }
 0x8df   :  { %v1207_v8 = vpop.xlane.xlu1 %1206 }
 0x8e1   :  { %v1205_v9 = vpop.xlane.xlu0 %1204 }
 0x8e2   :  { %2051 = vlog2.f32 %v1205_v9  ;;  %v1122_v9 = vshll.u32 %v1121_v21, 16 }
 0x8e3   :  { %v2953_v43 = vpop.xlane.xlu1 %1212  ;;  %2053 = vlog2.f32 %v1207_v8 }
 0x8e5   :  { %v1209_v38 = vpop.xlane.xlu0 %1208 }
 0x8e6   :  { %2055 = vlog2.f32 %v1209_v38 }
 0x8e7   :  { %v1077_v0 = vpop.xlane.xlu1 %1076 }
 0x8e8   :  { %v1078_v16 = vcvt.f32.s32 %v1077_v0  ;;  %v1136_v0 = vshll.u32 %v1135_v63, 16 }
 0x8e9   :  { %v2957_v3 = vpop.xlane.xlu0 %1210 }
 0x8ea   :  { %v1081_v11 = vadd.s32 %v1080_v37, %v1078_v16  ;;  %2057 = vlog2.f32 %v2957_v3 }
 0x8eb   :  { %v1105_v36 = vpop.xlane.xlu1 %1104  ;;  %2059 = vlog2.f32 %v2953_v43  ;;  %v1163_v43 = vcvt.f32.s32 %v2888_v13 }
 0x8ec   :  { %v1404_v48 = vcvt.s32.f32 %v1081_v11  ;;  %v1106_v17 = vcvt.f32.s32 %v1105_v36  ;;  %vm1354_vm5 = vcmp.eq.s32.totalorder %v1081_v11, %v2761_v4 }
 0x8ed   :  { %v2964_v5 = vpop.xlane.xlu0 %1214  ;;  %v1484_v61 = vsel %vm1354_vm5, 1.0, %v3110_v25 }
 0x8ee   :  { %v1412_v32 = vsel %vm1403_vm4, %v1404_v48, %v2384_v30  ;;  %v1109_v62 = vadd.s32 %v1108_v26, %v1106_v17  ;;  %2061 = vlog2.f32 %v2964_v5 }
 0x8ef   :  { %1420 = vst [vmem:[#allocation9] sm:$0xff] %v1412_v32  ;;  %v1277_v47 = vpop.xlane.xlu1 %1276  ;;  %v2052_v27 = vpop.eup %2051 }
 0x8f0   :  { %vm1356_vm6 = vcmp.eq.s32.totalorder %v1109_v62, %v2707_v18  ;;  %v1406_v60 = vcvt.s32.f32 %v1109_v62  ;;  %v1221_v40 = vmul.f32 0.6931472, %v2052_v27  ;;  %v2054_v1 = vpop.eup %2053 }
 0x8f1   :  { %v1091_v10 = vpop.xlane.xlu0 %1090  ;;  %v1486_v53 = vsel %vm1356_vm6, 1.0, %v3110_v25  ;;  %v1223_v31 = vmul.f32 0.6931472, %v2054_v1  ;;  %v3111_v1 = vld [vmem:[#allocation13_spill] sm:$0xff] }
 0x8f2   :  { %v1414_v30 = vsel %vm1403_vm4, %v1406_v60, %v2494_v52  ;;  %v1292_v4 = vadd.f32 %v1221_v40, %v2661_v50  ;;  %v1092_v33 = vcvt.f32.s32 %v1091_v10  ;;  %v1378_v52 = vmul.f32 %v1484_v61, %v2894_v23 }
 0x8f3   :  { %1422 = vst [vmem:[#allocation9 + $0x10] sm:$0xff] %v1414_v30  ;;  %v2975_v18 = vpop.xlane.xlu1 %1216  ;;  %v1380_v8 = vmul.f32 %v1486_v53, %v2908_v19  ;;  %v1293_v11 = vadd.f32 %v1223_v31, %v2654_v45  ;;  %v2056_v36 = vpop.eup %2055 }
 0x8f4   :  { %v1300_v29 = vsub.f32 %v1292_v4, %v1277_v47  ;;  %v1095_v59 = vadd.s32 %v1094_v58, %v1092_v33  ;;  %v1386_v26 = vsel %vm77_vm2, %v1378_v52, 0.0  ;;  %v1225_v40 = vmul.f32 0.6931472, %v2056_v36  ;;  %v3113_v52 = vld [vmem:[#allocation17_spill] sm:$0xff] }
 0x8f5   :  { %v1119_v6 = vpop.xlane.xlu0 %1118  ;;  %v1389_v39 = vsel %vm77_vm2, %v1380_v8, 0.0  ;;  %2063 = vlog2.f32 %v2975_v18 }
 0x8f6   :  { %vm1355_vm7 = vcmp.eq.s32.totalorder %v1095_v59, %v2698_v15  ;;  %v1405_v56 = vcvt.s32.f32 %v1095_v59  ;;  %v1120_v50 = vcvt.f32.s32 %v1119_v6  ;;  %v1308_v32 = vmul.f32 %v2894_v23, %v1300_v29 }
 0x8f7   :  { %v1133_v38 = vpop.xlane.xlu1 %1132  ;;  %v1485_v37 = vsel %vm1355_vm7, 1.0, %v3110_v25  ;;  %v1294_v6 = vadd.f32 %v1225_v40, %v3113_v52 }
 0x8f8   :  { %v1134_v54 = vcvt.f32.s32 %v1133_v38  ;;  %v1413_v14 = vsel %vm1403_vm4, %v1405_v56, %v2448_v41  ;;  %v1123_v16 = vadd.s32 %v1122_v9, %v1120_v50  ;;  %v1379_v48 = vmul.f32 %v1485_v37, %v2897_v35 }
 0x8f9   :  { %1421 = vst [vmem:[#allocation9 + $0x8] sm:$0xff] %v1413_v14  ;;  %v1279_v17 = vpop.xlane.xlu0 %1278  ;;  %v1318_v63 = vsel %vm77_vm2, %v1308_v32, 0.0 }
 0x8fa   :  { %v1137_v15 = vadd.s32 %v1136_v0, %v1134_v54  ;;  %vm1357_vm8 = vcmp.eq.s32.totalorder %v1123_v16, %v2716_v46  ;;  %v1407_v62 = vcvt.s32.f32 %v1123_v16  ;;  %v1301_v47 = vsub.f32 %v1293_v11, %v1279_v17  ;;  %v3112_v46 = vld [vmem:[#allocation14_spill] sm:$0xff]  ;;  %v3114_v0 = vld [vmem:[#allocation15_spill] sm:$0xff]  ;;  %v2058_v16 = vpop.eup %2057  ;;  %v3115_v17 = vld [vmem:[#allocation20_spill] sm:$0xff] }
 0x8fb   :  { %v1147_v41 = vpop.xlane.xlu1 %1146  ;;  %v1487_v27 = vsel %vm1357_vm8, 1.0, %v3110_v25  ;;  %v1387_v60 = vsel %vm77_vm2, %v1379_v48, 0.0  ;;  %v1227_v11 = vmul.f32 0.6931472, %v2058_v16 }
 0x8fc   :  { %vm1358_vm9 = vcmp.eq.s32.totalorder %v1137_v15, %v2818_v55  ;;  %v1408_v45 = vcvt.s32.f32 %v1137_v15  ;;  %v1415_v58 = vsel %vm1403_vm4, %v1407_v62, %v3111_v1  ;;  %v1388_v23 = vadd.f32 %v1387_v60, %v1386_v26  ;;  %v2060_v15 = vpop.eup %2059  ;;  %v3116_v60 = vld [vmem:[#allocation18_spill] sm:$0xff] }
 0x8fd   :  { %v1488_v21 = vsel %vm1358_vm9, 1.0, %v3110_v25  ;;  %1423 = vst [vmem:[#allocation9 + $0x18] sm:$0xff] %v1415_v58  ;;  %v1309_v10 = vmul.f32 %v2897_v35, %v1301_v47  ;;  %v1148_v61 = vcvt.f32.s32 %v1147_v41  ;;  %v1219_v55 = vpop.xlane.xlu0 %1218  ;;  %v1381_v53 = vmul.f32 %v1487_v27, %v2917_v57  ;;  %v2062_v3 = vpop.eup %2061 }
 0x8fe   :  { %v1416_v30 = vsel %vm1403_vm4, %v1408_v45, %v3112_v46  ;;  %v1390_v4 = vadd.f32 %v1389_v39, %v1388_v23  ;;  %v1382_v33 = vmul.f32 %v1488_v21, %v2924_v24  ;;  %2065 = vlog2.f32 %v1219_v55  ;;  %v3118_v55 = vld [vmem:[#allocation19_spill] sm:$0xff] }
 0x8ff   :  { %1424 = vst [vmem:[#allocation9 + $0x20] sm:$0xff] %v1416_v30  ;;  %v1319_v28 = vsel %vm77_vm2, %v1309_v10, 0.0  ;;  %v1151_v31 = vadd.s32 %v1150_v34, %v1148_v61  ;;  %v1391_v29 = vsel %vm77_vm2, %v1381_v53, 0.0  ;;  %v1295_v26 = vadd.f32 %v1227_v11, %v2659_v49 }
 0x900   :  { %v1320_v59 = vadd.f32 %v1319_v28, %v1318_v63  ;;  %v1392_v8 = vadd.f32 %v1391_v29, %v1390_v4  ;;  %v1393_v35 = vsel %vm77_vm2, %v1382_v33, 0.0  ;;  %v1229_v39 = vmul.f32 0.6931472, %v2060_v15 }
 0x901   :  { %v1409_v9 = vcvt.s32.f32 %v1151_v31  ;;  %v1281_v56 = vpop.xlane.xlu0 %1280  ;;  %vm1359_vm10 = vcmp.eq.s32.totalorder %v1151_v31, %v3115_v17  ;;  %v1231_v49 = vmul.f32 0.6931472, %v2062_v3 }
 0x902   :  { %v1302_v50 = vsub.f32 %v1294_v6, %v1281_v56  ;;  %v3010_v38 = vadd.f32 %v1393_v35, %v1392_v8  ;;  %v2064_v62 = vpop.eup %2063  ;;  %v1489_v47 = vsel %vm1359_vm10, 1.0, %v3110_v25  ;;  %v1296_v40 = vadd.f32 %v1229_v39, %v3116_v60  ;;  %v3119_v35 = vld [vmem:[#allocation21_spill] sm:$0xff] }
 0x903   :  { %v1417_v37 = vsel %vm1403_vm4, %v1409_v9, %v3114_v0  ;;  %v1233_v1 = vmul.f32 0.6931472, %v2064_v62  ;;  %v1383_v13 = vmul.f32 %v1489_v47, %v2930_v42  ;;  %v1297_v63 = vadd.f32 %v1231_v49, %v2678_v2 }
 0x904   :  { %1425 = vst [vmem:[#allocation9 + $0x28] sm:$0xff] %v1417_v37  ;;  %v1310_v54 = vmul.f32 %v2908_v19, %v1302_v50  ;;  %v1177_v19 = vcvt.f32.s32 %v2881_v12  ;;  %v1164_v12 = vshll.u32 %v1163_v43, 16  ;;  %v3120_v37 = vld [vmem:[#allocation16_spill] sm:$0xff] }
 0x905   :  { %v1283_v36 = vpop.xlane.xlu0 %1282  ;;  %v1298_v52 = vadd.f32 %v1233_v1, %v2794_v22 }
 0x906   :  { %v1321_v34 = vsel %vm77_vm2, %v1310_v54, 0.0  ;;  %v1303_v48 = vsub.f32 %v1295_v26, %v1283_v36  ;;  %v1178_v18 = vshll.u32 %v1177_v19, 16 }
 0x907   :  { %v1322_v14 = vadd.f32 %v1321_v34, %v1320_v59  ;;  %v1395_v59 = vsel %vm77_vm2, %v1383_v13, 0.0 }
 0x908   :  { %v1311_v32 = vmul.f32 %v2917_v57, %v1303_v48  ;;  %v3117_v57 = vld [vmem:[#allocation22_spill] sm:$0xff]  ;;  %v1396_v16 = vadd.f32 %v1395_v59, %v3010_v38 }
 0x90a   :  { %v1323_v58 = vsel %vm77_vm2, %v1311_v32, 0.0 }
 0x90b   :  { %v2066_v27 = vpop.eup %2065  ;;  %v1324_v28 = vadd.f32 %v1323_v58, %v1322_v14 }
 0x90c   :  { %v1235_v61 = vmul.f32 0.6931472, %v2066_v27 }
 0x90e   :  { %v1299_v0 = vadd.f32 %v1235_v61, %v2790_v20 }
 0x936   :  { %v1175_v5 = vpop.xlane.xlu1 %1174 }
 0x937   :  { %v1176_v41 = vcvt.f32.s32 %v1175_v5 }
 0x939   :  { %v1179_v45 = vadd.s32 %v1178_v18, %v1176_v41 }
 0x93a   :  { %v1285_v21 = vpop.xlane.xlu0 %1284  ;;  %v1161_v23 = vpop.xlane.xlu1 %1160 }
 0x93b   :  { %vm1361_vm11 = vcmp.eq.s32.totalorder %v1179_v45, %v3117_v57  ;;  %v1411_v46 = vcvt.s32.f32 %v1179_v45  ;;  %v1304_v30 = vsub.f32 %v1296_v40, %v1285_v21  ;;  %v1162_v10 = vcvt.f32.s32 %v1161_v23 }
 0x93c   :  { %v1491_v31 = vsel %vm1361_vm11, 1.0, %v3110_v25 }
 0x93d   :  { %v1419_v53 = vsel %vm1403_vm4, %v1411_v46, %v3118_v55  ;;  %v1312_v4 = vmul.f32 %v2924_v24, %v1304_v30  ;;  %v1165_v33 = vadd.s32 %v1164_v12, %v1162_v10  ;;  %v1385_v14 = vmul.f32 %v1491_v31, %v2942_v7 }
 0x93e   :  { %1427 = vst [vmem:[#allocation9 + $0x38] sm:$0xff] %v1419_v53  ;;  %v1287_v29 = vpop.xlane.xlu0 %1286  ;;  %v1289_v6 = vpop.xlane.xlu1 %1288 }
 0x93f   :  { %v1325_v8 = vsel %vm77_vm2, %v1312_v4, 0.0  ;;  %vm1360_vm12 = vcmp.eq.s32.totalorder %v1165_v33, %v3119_v35  ;;  %v1410_v24 = vcvt.s32.f32 %v1165_v33  ;;  %v1305_v9 = vsub.f32 %v1297_v63, %v1287_v29 }
 0x940   :  { %v1326_v56 = vadd.f32 %v1325_v8, %v1324_v28  ;;  %v1490_v2 = vsel %vm1360_vm12, 1.0, %v3110_v25  ;;  %v1306_v50 = vsub.f32 %v1298_v52, %v1289_v6 }
 0x941   :  { %v1418_v54 = vsel %vm1403_vm4, %v1410_v24, %v3120_v37  ;;  %v1313_v22 = vmul.f32 %v2930_v42, %v1305_v9  ;;  %v1384_v34 = vmul.f32 %v1490_v2, %v2937_v51 }
 0x942   :  { %1426 = vst [vmem:[#allocation9 + $0x30] sm:$0xff] %v1418_v54  ;;  %v1314_v11 = vmul.f32 %v2937_v51, %v1306_v50  ;;  %v1291_v25 = vpop.xlane.xlu0 %1290 }
 0x943   :  { %v1327_v36 = vsel %vm77_vm2, %v1313_v22, 0.0  ;;  %v1397_v20 = vsel %vm77_vm2, %v1384_v34, 0.0  ;;  %v1307_v26 = vsub.f32 %v1299_v0, %v1291_v25 }
 0x944   :  { %2138 = shalt.err (!%p2135_p5)
}
 0x945   :  { %1439 = dma.vmem_to_hbm [thread:$0]  %s1434_s27, 1024, %s3084_s7, [#allocation5], %s2155_s18, %s2155_s18, %s2156_s19   ;;  %v1328_v44 = vadd.f32 %v1327_v36, %v1326_v56  ;;  %v1398_v42 = vadd.f32 %v1397_v20, %v1396_v16  ;;  %v1329_v51 = vsel %vm77_vm2, %v1314_v11, 0.0  ;;  %v1315_v38 = vmul.f32 %v2942_v7, %v1307_v26 }
 0x946   :  { %v1353_v15 = vld [vmem:[%s3087_s10] sm:$0xff]  ;;  %v1399_v48 = vsel %vm77_vm2, %v1385_v14, 0.0 }
 0x947   :  { %v1330_v19 = vadd.f32 %v1329_v51, %v1328_v44  ;;  %v1400_v17 = vadd.f32 %v1399_v48, %v1398_v42  ;;  %v1316_v39 = vld [vmem:[%s3085_s8] sm:$0xff]  ;;  %v1331_v3 = vsel %vm77_vm2, %v1315_v38, 0.0 }
 0x949   :  { %v1332_v43 = vadd.f32 %v1331_v3, %v1330_v19  ;;  %v1401_v32 = vadd.f32 %v1400_v17, %v1353_v15 }
 0x94b   :  { %v1333_v5 = vadd.f32 %v1332_v43, %v1316_v39  ;;  %1402 = vst.msk [vmem:[%s3087_s10] sm:$0xff] %vm77_vm2, %v1401_v32 }
 0x94d   :  { %1334 = vst.msk [vmem:[%s3085_s8] sm:$0xff] %vm77_vm2, %v1333_v5 }
 0x94e   :  { %2151 = dma.done.wait [#allocation5], 1024  }
 0x94f   :  { %2152 = vsyncadd [#allocation5], 4294966272 }
 0x950   :  { %1455 = vsyncpa [#allocation4], 1 }
 0x951   :  { %1456 = vsyncpa [#allocation7], 1 }
 0x952   :  { %1457 = vsyncpa [#allocation5], 1 }

</bundles_post_ra>
